<compile_context>
chip_gen: v6e
topology: v6e:2x2x1
jax: 0.10.0
libtpu: 0.0.40
codegen_flags: <defaults>
</compile_context>

<pallas_src>
import functools

import jax
import jax.numpy as jnp
from jax.experimental import pallas as pl
from jax.experimental.pallas import tpu as pltpu


def _round_up(x, m):
    return (x + m - 1) // m * m


def _srcnn_fused_kernel(x_ref, w1_ref, b1_ref, w2_ref, b2_ref, w3_ref, b3_ref,
                        o_ref, *, width, k1, k2, k3, l1, l2, l3, compute_dtype):
    """Fused 3-layer SRCNN forward for one block of lane-concatenated images.

    x_ref : (Cin_pad, Ltot)   channels-major; each image owns one 128-aligned
                              L0-lane segment (tail padding absorbs the
                              shifted-window overhang; garbage borders are
                              cropped by the wrapper).
    wN_ref: (CoutN_pad, kN*kN*CinN_pad)  tap-stacked packed weights.
    bN_ref: (CoutN_pad, 1)
    o_ref : (Cout_pad, l3)    lane-dense (l3 % 128 == 0) output slab.
    """

    def conv_layer(a, w_ref, b_ref, k, l_out, relu):
        # Stack the k*k shifted lane-windows along the contraction (sublane)
        # axis -> a single MXU dot performs the whole tap accumulation.
        if k == 1:
            stacked = a[:, :l_out]
        else:
            taps = []
            for dy in range(k):
                for dx in range(k):
                    off = dy * width + dx
                    taps.append(a[:, off:off + l_out])
            stacked = jnp.concatenate(taps, axis=0)          # (k*k*cin_pad, l_out)
        w = w_ref[...].astype(compute_dtype)                  # (cout_pad, k*k*cin_pad)
        acc = jnp.dot(w, stacked.astype(compute_dtype),
                      preferred_element_type=jnp.float32)
        acc = acc + b_ref[...]                                 # (cout_pad, 1) bcast
        if relu:
            acc = jnp.maximum(acc, 0.0)
        return acc

    x = x_ref[...].astype(jnp.float32)
    a1 = conv_layer(x, w1_ref, b1_ref, k1, l1, relu=True)
    a2 = conv_layer(a1, w2_ref, b2_ref, k2, l2, relu=True)
    a3 = conv_layer(a2, w3_ref, b3_ref, k3, l3, relu=False)
    o_ref[...] = a3.astype(o_ref.dtype)


def srcnn_forward(x_nchw, params, *, compute_dtype=jnp.float32):
    """Forward pass matching SRCNN: relu(conv1) -> relu(conv2) -> conv3."""
    (w1, b1), (w2, b2), (w3, b3) = params
    n, cin, h, w = x_nchw.shape
    k1, k2, k3 = w1.shape[2], w2.shape[2], w3.shape[2]
    n1, n2, cout = w1.shape[0], w2.shape[0], w3.shape[0]
    ktot = (k1 - 1) + (k2 - 1) + (k3 - 1)
    hout, wout = h - ktot, w - ktot

    # Sublane-pad channel counts to multiples of 8 (zero-padded weights/bias ->
    # identical results on real channels, aligned concat/stores in the kernel).
    c0p = _round_up(cin, 8)
    c1p = _round_up(n1, 8)
    c2p = _round_up(n2, 8)
    c3p = _round_up(cout, 8)

    # Lane geometry: each image occupies a 128-aligned L0 segment whose tail
    # padding absorbs the total shifted-window overhang ktot*(w+1).
    lout_pad = _round_up(h * w, 128)
    l0 = _round_up(lout_pad + ktot * (w + 1), 128)
    # Pack several images per grid step (lane-concatenated) so each step's dot
    # N is >= ~512 lanes; for larger images ipb -> 1 and the batch grid stays
    # "parallel"-shardable across TensorCores.
    ipb = max(1, min(n, -(-512 // l0)))
    nblk = -(-n // ipb)
    n_tot = nblk * ipb
    ltot = ipb * l0

    # Per-layer output lane extents (the last one is the 128-aligned store
    # extent; every shifted slice stays inside the previous layer's extent).
    l3 = (ipb - 1) * l0 + lout_pad
    l2 = l3 + (k3 - 1) * (w + 1)
    l1 = l2 + (k2 - 1) * (w + 1)

    # Input: NCHW -> channels-major flattened; pad batch/channels/lanes, then
    # lane-concatenate the images of each block.
    x_flat = x_nchw.reshape(n, cin, h * w)
    x_flat = jnp.pad(x_flat, ((0, n_tot - n), (0, c0p - cin), (0, l0 - h * w)))
    x_blk = (x_flat.reshape(nblk, ipb, c0p, l0)
             .transpose(0, 2, 1, 3)
             .reshape(nblk, c0p, ltot))

    def prep_w(wt, ci_pad, co_pad):
        # OIHW -> tap-stacked (co_pad, kh*kw*ci_pad); column (t*ci_pad + c)
        # multiplies the stacked activation row for tap t = dy*kw + dx, chan c.
        o, i, kh, kw = wt.shape
        wp = jnp.zeros((co_pad, kh * kw, ci_pad), jnp.float32)
        wp = wp.at[:o, :, :i].set(
            jnp.transpose(wt, (0, 2, 3, 1)).reshape(o, kh * kw, i))
        return wp.reshape(co_pad, kh * kw * ci_pad)

    def prep_b(bv, co_pad):
        return jnp.pad(bv.astype(jnp.float32),
                       (0, co_pad - bv.shape[0])).reshape(co_pad, 1)

    w1p, w2p, w3p = prep_w(w1, c0p, c1p), prep_w(w2, c1p, c2p), prep_w(w3, c2p, c3p)
    b1p, b2p, b3p = prep_b(b1, c1p), prep_b(b2, c2p), prep_b(b3, c3p)

    kernel = functools.partial(_srcnn_fused_kernel, width=w,
                               k1=k1, k2=k2, k3=k3, l1=l1, l2=l2, l3=l3,
                               compute_dtype=compute_dtype)

    def const_spec(shape):   # weights/biases: constant block index, VMEM-resident
        return pl.BlockSpec(shape, lambda j, _nd=len(shape): (0,) * _nd)

    out_blk = pl.pallas_call(
        kernel,
        out_shape=jax.ShapeDtypeStruct((nblk, c3p, l3), x_nchw.dtype),
        grid=(nblk,),
        in_specs=[
            pl.BlockSpec((None, c0p, ltot), lambda j: (j, 0, 0)),   # image block
            const_spec(w1p.shape), const_spec(b1p.shape),
            const_spec(w2p.shape), const_spec(b2p.shape),
            const_spec(w3p.shape), const_spec(b3p.shape),
        ],
        out_specs=pl.BlockSpec((None, c3p, l3), lambda j: (j, 0, 0)),
        compiler_params=pltpu.CompilerParams(
            dimension_semantics=("parallel",)),
    )(x_blk, w1p, b1p, w2p, b2p, w3p, b3p)

    # Un-concatenate the lane segments, crop channel/lane/batch padding and the
    # garbage right/bottom borders of the VALID convolutions.
    out = jnp.pad(out_blk, ((0, 0), (0, 0), (0, ltot - l3)))
    out = (out.reshape(nblk, c3p, ipb, l0)
           .transpose(0, 2, 1, 3)
           .reshape(n_tot, c3p, l0))
    out = out[:n, :cout, :h * w].reshape(n, cout, h, w)[:, :, :hout, :wout]
    return out


def init_srcnn_params(key, kernel_list, filters_list, num_channels=3):
    """xavier_normal_ weights (PyTorch OIHW layout), zero biases."""
    f1, f2, f3 = kernel_list
    n1, n2, _n3 = filters_list  # n3 unused, same as the PyTorch module

    def xavier_conv(k, co, ci, kh, kw):
        fan_in = ci * kh * kw
        fan_out = co * kh * kw
        std = (2.0 / (fan_in + fan_out)) ** 0.5
        return jax.random.normal(k, (co, ci, kh, kw), jnp.float32) * std

    k1, k2, k3 = jax.random.split(key, 3)
    w1 = xavier_conv(k1, n1, num_channels, f1, f1)
    w2 = xavier_conv(k2, n2, n1, f2, f2)
    w3 = xavier_conv(k3, num_channels, n2, f3, f3)
    b1 = jnp.zeros((n1,), jnp.float32)
    b2 = jnp.zeros((n2,), jnp.float32)
    b3 = jnp.zeros((num_channels,), jnp.float32)
    return ((w1, b1), (w2, b2), (w3, b3))


def _conv_ref(x, w, b):
    y = jax.lax.conv_general_dilated(
        x, w, window_strides=(1, 1), padding="VALID",
        dimension_numbers=("NCHW", "OIHW", "NCHW"))
    return y + b[None, :, None, None]


def _srcnn_ref(x, params):
    (w1, b1), (w2, b2), (w3, b3) = params
    x = jnp.maximum(_conv_ref(x, w1, b1), 0.0)
    x = jnp.maximum(_conv_ref(x, w2, b2), 0.0)
    return _conv_ref(x, w3, b3)


if __name__ == "__main__":
    # Small, module-consistent configuration.
    kernel_list = (5, 1, 3)
    filters_list = (16, 8, 3)
    num_channels = 3

    root = jax.random.PRNGKey(0)
    kx, kp, kb1, kb2, kb3 = jax.random.split(root, 5)
    x = jax.random.normal(kx, (2, num_channels, 16, 16), jnp.float32)  # NCHW

    (w1, _), (w2, _), (w3, _) = init_srcnn_params(
        kp, kernel_list, filters_list, num_channels)
    # Non-zero biases so the bias path is actually exercised (the module itself
    # initializes biases to zero).
    b1 = 0.1 * jax.random.normal(kb1, (filters_list[0],), jnp.float32)
    b2 = 0.1 * jax.random.normal(kb2, (filters_list[1],), jnp.float32)
    b3 = 0.1 * jax.random.normal(kb3, (num_channels,), jnp.float32)
    params = ((w1, b1), (w2, b2), (w3, b3))

    out = jax.jit(srcnn_forward)(x, params)
    out = jax.block_until_ready(out)

    ref = _srcnn_ref(x, params)
    assert out.shape == ref.shape == (2, num_channels, 10, 10), out.shape
    assert jnp.allclose(out, ref, atol=1e-4, rtol=1e-4), "mismatch vs JAX reference"

    print("KERNEL_OK")
</pallas_src>

<mosaic_0001>
module attributes {stable_mosaic.version = 11 : i64} {
  func.func @_srcnn_fused_kernel(%arg0: i32, %arg1: memref<1x8x768xf32, #tpu.memory_space<vmem>>, %arg2: memref<16x200xf32, #tpu.memory_space<vmem>>, %arg3: memref<16x1xf32, #tpu.memory_space<vmem>>, %arg4: memref<8x16xf32, #tpu.memory_space<vmem>>, %arg5: memref<8x1xf32, #tpu.memory_space<vmem>>, %arg6: memref<8x72xf32, #tpu.memory_space<vmem>>, %arg7: memref<8x1xf32, #tpu.memory_space<vmem>>, %arg8: memref<1x8x640xf32, #tpu.memory_space<vmem>>) attributes {dimension_semantics = [#tpu.dimension_semantics<parallel>], iteration_bounds = array<i64: 1>, scalar_prefetch = 0 : i64, scratch_operands = 0 : i64, tpu.core_type = #tpu.core_type<tc>, window_params = [{transform_indices = @transform_0, window_bounds = array<i64: 1, 8, 768>}, {pipeline_mode = #tpu.pipeline_mode<synchronous>, transform_indices = @transform_1, window_bounds = array<i64: 16, 200>}, {pipeline_mode = #tpu.pipeline_mode<synchronous>, transform_indices = @transform_2, window_bounds = array<i64: 16, 1>}, {pipeline_mode = #tpu.pipeline_mode<synchronous>, transform_indices = @transform_3, window_bounds = array<i64: 8, 16>}, {pipeline_mode = #tpu.pipeline_mode<synchronous>, transform_indices = @transform_4, window_bounds = array<i64: 8, 1>}, {pipeline_mode = #tpu.pipeline_mode<synchronous>, transform_indices = @transform_5, window_bounds = array<i64: 8, 72>}, {pipeline_mode = #tpu.pipeline_mode<synchronous>, transform_indices = @transform_6, window_bounds = array<i64: 8, 1>}, {transform_indices = @transform_7, window_bounds = array<i64: 1, 8, 640>}]} {
    %c0 = arith.constant 0 : index
    %c0_0 = arith.constant 0 : index
    %c0_1 = arith.constant 0 : index
    %0 = vector.load %arg1[%c0, %c0_0, %c0_1] : memref<1x8x768xf32, #tpu.memory_space<vmem>>, vector<1x8x768xf32>
    %1 = vector.shape_cast %0 : vector<1x8x768xf32> to vector<8x768xf32>
    %2 = vector.extract_strided_slice %1 {offsets = [0, 0], sizes = [8, 674], strides = [1, 1]} : vector<8x768xf32> to vector<8x674xf32>
    %3 = vector.extract_strided_slice %1 {offsets = [0, 1], sizes = [8, 674], strides = [1, 1]} : vector<8x768xf32> to vector<8x674xf32>
    %4 = vector.extract_strided_slice %1 {offsets = [0, 2], sizes = [8, 674], strides = [1, 1]} : vector<8x768xf32> to vector<8x674xf32>
    %5 = vector.extract_strided_slice %1 {offsets = [0, 3], sizes = [8, 674], strides = [1, 1]} : vector<8x768xf32> to vector<8x674xf32>
    %6 = vector.extract_strided_slice %1 {offsets = [0, 4], sizes = [8, 674], strides = [1, 1]} : vector<8x768xf32> to vector<8x674xf32>
    %7 = vector.extract_strided_slice %1 {offsets = [0, 16], sizes = [8, 674], strides = [1, 1]} : vector<8x768xf32> to vector<8x674xf32>
    %8 = vector.extract_strided_slice %1 {offsets = [0, 17], sizes = [8, 674], strides = [1, 1]} : vector<8x768xf32> to vector<8x674xf32>
    %9 = vector.extract_strided_slice %1 {offsets = [0, 18], sizes = [8, 674], strides = [1, 1]} : vector<8x768xf32> to vector<8x674xf32>
    %10 = vector.extract_strided_slice %1 {offsets = [0, 19], sizes = [8, 674], strides = [1, 1]} : vector<8x768xf32> to vector<8x674xf32>
    %11 = vector.extract_strided_slice %1 {offsets = [0, 20], sizes = [8, 674], strides = [1, 1]} : vector<8x768xf32> to vector<8x674xf32>
    %12 = vector.extract_strided_slice %1 {offsets = [0, 32], sizes = [8, 674], strides = [1, 1]} : vector<8x768xf32> to vector<8x674xf32>
    %13 = vector.extract_strided_slice %1 {offsets = [0, 33], sizes = [8, 674], strides = [1, 1]} : vector<8x768xf32> to vector<8x674xf32>
    %14 = vector.extract_strided_slice %1 {offsets = [0, 34], sizes = [8, 674], strides = [1, 1]} : vector<8x768xf32> to vector<8x674xf32>
    %15 = vector.extract_strided_slice %1 {offsets = [0, 35], sizes = [8, 674], strides = [1, 1]} : vector<8x768xf32> to vector<8x674xf32>
    %16 = vector.extract_strided_slice %1 {offsets = [0, 36], sizes = [8, 674], strides = [1, 1]} : vector<8x768xf32> to vector<8x674xf32>
    %17 = vector.extract_strided_slice %1 {offsets = [0, 48], sizes = [8, 674], strides = [1, 1]} : vector<8x768xf32> to vector<8x674xf32>
    %18 = vector.extract_strided_slice %1 {offsets = [0, 49], sizes = [8, 674], strides = [1, 1]} : vector<8x768xf32> to vector<8x674xf32>
    %19 = vector.extract_strided_slice %1 {offsets = [0, 50], sizes = [8, 674], strides = [1, 1]} : vector<8x768xf32> to vector<8x674xf32>
    %20 = vector.extract_strided_slice %1 {offsets = [0, 51], sizes = [8, 674], strides = [1, 1]} : vector<8x768xf32> to vector<8x674xf32>
    %21 = vector.extract_strided_slice %1 {offsets = [0, 52], sizes = [8, 674], strides = [1, 1]} : vector<8x768xf32> to vector<8x674xf32>
    %22 = vector.extract_strided_slice %1 {offsets = [0, 64], sizes = [8, 674], strides = [1, 1]} : vector<8x768xf32> to vector<8x674xf32>
    %23 = vector.extract_strided_slice %1 {offsets = [0, 65], sizes = [8, 674], strides = [1, 1]} : vector<8x768xf32> to vector<8x674xf32>
    %24 = vector.extract_strided_slice %1 {offsets = [0, 66], sizes = [8, 674], strides = [1, 1]} : vector<8x768xf32> to vector<8x674xf32>
    %25 = vector.extract_strided_slice %1 {offsets = [0, 67], sizes = [8, 674], strides = [1, 1]} : vector<8x768xf32> to vector<8x674xf32>
    %26 = vector.extract_strided_slice %1 {offsets = [0, 68], sizes = [8, 674], strides = [1, 1]} : vector<8x768xf32> to vector<8x674xf32>
    %27 = tpu.concatenate %2, %3, %4, %5, %6, %7, %8, %9, %10, %11, %12, %13, %14, %15, %16, %17 in 0 : vector<8x674xf32>, vector<8x674xf32>, vector<8x674xf32>, vector<8x674xf32>, vector<8x674xf32>, vector<8x674xf32>, vector<8x674xf32>, vector<8x674xf32>, vector<8x674xf32>, vector<8x674xf32>, vector<8x674xf32>, vector<8x674xf32>, vector<8x674xf32>, vector<8x674xf32>, vector<8x674xf32>, vector<8x674xf32> -> vector<128x674xf32>
    %28 = tpu.concatenate %18, %19, %20, %21, %22, %23, %24, %25, %26 in 0 : vector<8x674xf32>, vector<8x674xf32>, vector<8x674xf32>, vector<8x674xf32>, vector<8x674xf32>, vector<8x674xf32>, vector<8x674xf32>, vector<8x674xf32>, vector<8x674xf32> -> vector<72x674xf32>
    %29 = tpu.concatenate %27, %28 in 0 : vector<128x674xf32>, vector<72x674xf32> -> vector<200x674xf32>
    %c0_2 = arith.constant 0 : index
    %c0_3 = arith.constant 0 : index
    %30 = vector.load %arg2[%c0_2, %c0_3] : memref<16x200xf32, #tpu.memory_space<vmem>>, vector<16x200xf32>
    %cst = arith.constant dense<0.000000e+00> : vector<16x674xf32>
    %31 = tpu.matmul %30, %29, %cst {dimension_numbers = #tpu.dot_dimension_numbers<[1], [0], [0], [1], [0, 0, 1, 1], [], []>} : vector<16x200xf32>, vector<200x674xf32>, vector<16x674xf32> -> vector<16x674xf32>
    %c0_4 = arith.constant 0 : index
    %c0_5 = arith.constant 0 : index
    %32 = vector.load %arg3[%c0_4, %c0_5] : memref<16x1xf32, #tpu.memory_space<vmem>>, vector<16x1xf32>
    %33 = vector.broadcast %32 : vector<16x1xf32> to vector<16x674xf32>
    %34 = arith.addf %31, %33 : vector<16x674xf32>
    %cst_6 = arith.constant 0.000000e+00 : f32
    %35 = vector.broadcast %cst_6 : f32 to vector<16x674xf32>
    %36 = arith.maximumf %34, %35 : vector<16x674xf32>
    %c0_7 = arith.constant 0 : index
    %c0_8 = arith.constant 0 : index
    %37 = vector.load %arg4[%c0_7, %c0_8] : memref<8x16xf32, #tpu.memory_space<vmem>>, vector<8x16xf32>
    %cst_9 = arith.constant dense<0.000000e+00> : vector<8x674xf32>
    %38 = tpu.matmul %37, %36, %cst_9 {dimension_numbers = #tpu.dot_dimension_numbers<[1], [0], [0], [1], [0, 0, 1, 1], [], []>} : vector<8x16xf32>, vector<16x674xf32>, vector<8x674xf32> -> vector<8x674xf32>
    %c0_10 = arith.constant 0 : index
    %c0_11 = arith.constant 0 : index
    %39 = vector.load %arg5[%c0_10, %c0_11] : memref<8x1xf32, #tpu.memory_space<vmem>>, vector<8x1xf32>
    %40 = vector.broadcast %39 : vector<8x1xf32> to vector<8x674xf32>
    %41 = arith.addf %38, %40 : vector<8x674xf32>
    %cst_12 = arith.constant 0.000000e+00 : f32
    %42 = vector.broadcast %cst_12 : f32 to vector<8x674xf32>
    %43 = arith.maximumf %41, %42 : vector<8x674xf32>
    %44 = vector.extract_strided_slice %43 {offsets = [0, 0], sizes = [8, 640], strides = [1, 1]} : vector<8x674xf32> to vector<8x640xf32>
    %45 = vector.extract_strided_slice %43 {offsets = [0, 1], sizes = [8, 640], strides = [1, 1]} : vector<8x674xf32> to vector<8x640xf32>
    %46 = vector.extract_strided_slice %43 {offsets = [0, 2], sizes = [8, 640], strides = [1, 1]} : vector<8x674xf32> to vector<8x640xf32>
    %47 = vector.extract_strided_slice %43 {offsets = [0, 16], sizes = [8, 640], strides = [1, 1]} : vector<8x674xf32> to vector<8x640xf32>
    %48 = vector.extract_strided_slice %43 {offsets = [0, 17], sizes = [8, 640], strides = [1, 1]} : vector<8x674xf32> to vector<8x640xf32>
    %49 = vector.extract_strided_slice %43 {offsets = [0, 18], sizes = [8, 640], strides = [1, 1]} : vector<8x674xf32> to vector<8x640xf32>
    %50 = vector.extract_strided_slice %43 {offsets = [0, 32], sizes = [8, 640], strides = [1, 1]} : vector<8x674xf32> to vector<8x640xf32>
    %51 = vector.extract_strided_slice %43 {offsets = [0, 33], sizes = [8, 640], strides = [1, 1]} : vector<8x674xf32> to vector<8x640xf32>
    %52 = vector.extract_strided_slice %43 {offsets = [0, 34], sizes = [8, 640], strides = [1, 1]} : vector<8x674xf32> to vector<8x640xf32>
    %53 = tpu.concatenate %44, %45, %46, %47, %48, %49, %50, %51, %52 in 0 : vector<8x640xf32>, vector<8x640xf32>, vector<8x640xf32>, vector<8x640xf32>, vector<8x640xf32>, vector<8x640xf32>, vector<8x640xf32>, vector<8x640xf32>, vector<8x640xf32> -> vector<72x640xf32>
    %c0_13 = arith.constant 0 : index
    %c0_14 = arith.constant 0 : index
    %54 = vector.load %arg6[%c0_13, %c0_14] : memref<8x72xf32, #tpu.memory_space<vmem>>, vector<8x72xf32>
    %cst_15 = arith.constant dense<0.000000e+00> : vector<8x640xf32>
    %55 = tpu.matmul %54, %53, %cst_15 {dimension_numbers = #tpu.dot_dimension_numbers<[1], [0], [0], [1], [0, 0, 1, 1], [], []>} : vector<8x72xf32>, vector<72x640xf32>, vector<8x640xf32> -> vector<8x640xf32>
    %c0_16 = arith.constant 0 : index
    %c0_17 = arith.constant 0 : index
    %56 = vector.load %arg7[%c0_16, %c0_17] : memref<8x1xf32, #tpu.memory_space<vmem>>, vector<8x1xf32>
    %57 = vector.broadcast %56 : vector<8x1xf32> to vector<8x640xf32>
    %58 = arith.addf %55, %57 : vector<8x640xf32>
    %c0_18 = arith.constant 0 : index
    %c0_19 = arith.constant 0 : index
    %c0_20 = arith.constant 0 : index
    %59 = vector.load %arg8[%c0_18, %c0_19, %c0_20] : memref<1x8x640xf32, #tpu.memory_space<vmem>>, vector<1x8x640xf32>
    %60 = vector.shape_cast %59 : vector<1x8x640xf32> to vector<8x640xf32>
    %61 = vector.shape_cast %58 : vector<8x640xf32> to vector<1x8x640xf32>
    tpu.vector_store %arg8[%c0_18, %c0_19, %c0_20], %61 {strides = array<i32>} : memref<1x8x640xf32, #tpu.memory_space<vmem>>, vector<1x8x640xf32>,
    return
  }
  func.func @transform_0(%arg0: i32) -> (i32, i32, i32) {
    %c0_i32 = arith.constant 0 : i32
    %c0_i32_0 = arith.constant 0 : i32
    %c0_i32_1 = arith.constant 0 : i32
    return %arg0, %c0_i32, %c0_i32_0 : i32, i32, i32
  }
  func.func @transform_1(%arg0: i32) -> (i32, i32) {
    %c0_i32 = arith.constant 0 : i32
    %c0_i32_0 = arith.constant 0 : i32
    %c0_i32_1 = arith.constant 0 : i32
    return %c0_i32, %c0_i32_0 : i32, i32
  }
  func.func @transform_2(%arg0: i32) -> (i32, i32) {
    %c0_i32 = arith.constant 0 : i32
    %c0_i32_0 = arith.constant 0 : i32
    %c0_i32_1 = arith.constant 0 : i32
    return %c0_i32, %c0_i32_0 : i32, i32
  }
  func.func @transform_3(%arg0: i32) -> (i32, i32) {
    %c0_i32 = arith.constant 0 : i32
    %c0_i32_0 = arith.constant 0 : i32
    %c0_i32_1 = arith.constant 0 : i32
    return %c0_i32, %c0_i32_0 : i32, i32
  }
  func.func @transform_4(%arg0: i32) -> (i32, i32) {
    %c0_i32 = arith.constant 0 : i32
    %c0_i32_0 = arith.constant 0 : i32
    %c0_i32_1 = arith.constant 0 : i32
    return %c0_i32, %c0_i32_0 : i32, i32
  }
  func.func @transform_5(%arg0: i32) -> (i32, i32) {
    %c0_i32 = arith.constant 0 : i32
    %c0_i32_0 = arith.constant 0 : i32
    %c0_i32_1 = arith.constant 0 : i32
    return %c0_i32, %c0_i32_0 : i32, i32
  }
  func.func @transform_6(%arg0: i32) -> (i32, i32) {
    %c0_i32 = arith.constant 0 : i32
    %c0_i32_0 = arith.constant 0 : i32
    %c0_i32_1 = arith.constant 0 : i32
    return %c0_i32, %c0_i32_0 : i32, i32
  }
  func.func @transform_7(%arg0: i32) -> (i32, i32, i32) {
    %c0_i32 = arith.constant 0 : i32
    %c0_i32_0 = arith.constant 0 : i32
    %c0_i32_1 = arith.constant 0 : i32
    return %arg0, %c0_i32, %c0_i32_0 : i32, i32, i32
  }
}

</mosaic_0001>

<bundles_post_ra>
// kernel: srcnn_forward.1
= control target key start
LH: loop header
LB: loop body
LE: loop exit
PB: predicated region body
PF: predicated region fallthrough
CT: control target
= control target key end

     0   :  { %s1602_s28 = smov 109   ;;  %s1603_s10 = smov 110   ;;  %vm218_vm0 = vcmask 891904   ;;  %vm194_vm1 = vcmask 900096   ;;  %vm170_vm2 = vcmask 908288   ;;  %vm2730_vm3 = vcmask 916480   ;;  %s2722_s0 = inlined_call_operand.vmem [shape: f32[1,8,768], index: 0, kind: input, shape index: {}]   ;;  %s2723_s1 = inlined_call_operand.vmem [shape: f32[16,200], index: 1, kind: input, shape index: {}]   ;;  %s2724_s2 = inlined_call_operand.vmem [shape: f32[16,1], index: 2, kind: input, shape index: {}]   ;;  %s2725_s4 = inlined_call_operand.vmem [shape: f32[8,1], index: 4, kind: input, shape index: {}]   ;;  %s2726_s3 = inlined_call_operand.vmem [shape: f32[8,16], index: 3, kind: input, shape index: {}]   ;;  %s2727_s6 = inlined_call_operand.vmem [shape: f32[8,1], index: 6, kind: input, shape index: {}]   ;;  %s2728_s5 = inlined_call_operand.vmem [shape: f32[8,72], index: 5, kind: input, shape index: {}]   ;;  %s2729_s7 = inlined_call_operand.vmem [shape: f32[1,8,640], index: 7, kind: output, shape index: {}]  }
   0x1   :  { %v1665_v0 = vld [vmem:[%s2722_s0 + $0x18] sm:$0xff]  ;;  %v1670_v1 = vld [vmem:[%s2722_s0 + $0x8] sm:$0xff]  ;;  %v1679_v2 = vld [vmem:[%s2722_s0 + $0x10] sm:$0xff]  ;;  %s1604_s11 = smov 111   ;;  %s1605_s12 = smov 112   ;;  %vm386_vm4 = vcmask 654336  }
   0x2   :  { %212 = vrot.lane.b32.xlu1 %v1665_v0, %s1602_s28  ;;  %208 = vrot.lane.b32.xlu0 %v1670_v1, %s1602_s28  ;;  %v1684_v3 = vld [vmem:[%s2722_s0] sm:$0xff]  ;;  %s1606_s13 = smov 113   ;;  %s1607_s14 = smov 125   ;;  %v1770_v5 = vld [vmem:[%s2722_s0 + $0x28] sm:$0xff]  ;;  %vm410_vm5 = vcmask 924672   ;;  %vm362_vm6 = vcmask 752640  }
   0x3   :  { %s1608_s15 = smov 126   ;;  %s1609_s16 = smov 127   ;;  %v1765_v4 = vld [vmem:[%s2722_s0 + $0x20] sm:$0xff]  ;;  %vm338_vm7 = vcmask 760832   ;;  %vm98_vm8 = vcmask 1022976   ;;  %vm314_vm9 = vcmask 769024  }
   0x4   :  { %s1610_s17 = smov 80   ;;  %s1611_s18 = smov 92   ;;  %vm74_vm10 = vcmask 1031168   ;;  %vm50_vm11 = vcmask 1039360   ;;  %vm290_vm12 = vcmask 777216   ;;  %vm640_vm13 = vcmask 588800  }
   0x5   :  { %s1612_s19 = smov 93   ;;  %s1613_s24 = smov 94   ;;  %vm266_vm14 = vcmask 785408   ;;  %vm242_vm15 = vcmask 883712  }
   0x6   :  { %210 = vrot.lane.b32.xlu0 %v1679_v2, %s1602_s28  ;;  %206 = vrot.lane.b32.xlu1 %v1684_v3, %s1602_s28  ;;  %s1614_s25 = smov 95   ;;  %s1615_s26 = smov 96  }
   0x7   :  { %s1616_s27 = smov 108   ;;  %s1618_s29 = smov 79  }
   0xa   :  { %184 = vrot.lane.b32.xlu0 %v1670_v1, %s1603_s10  ;;  %186 = vrot.lane.b32.xlu1 %v1679_v2, %s1603_s10 }
   0xe   :  { %188 = vrot.lane.b32.xlu0 %v1665_v0, %s1603_s10  ;;  %182 = vrot.lane.b32.xlu1 %v1684_v3, %s1603_s10 }
  0x12   :  { %160 = vrot.lane.b32.xlu0 %v1670_v1, %s1604_s11  ;;  %162 = vrot.lane.b32.xlu1 %v1679_v2, %s1604_s11 }
  0x16   :  { %164 = vrot.lane.b32.xlu0 %v1665_v0, %s1604_s11  ;;  %158 = vrot.lane.b32.xlu1 %v1684_v3, %s1604_s11 }
  0x1a   :  { %136 = vrot.lane.b32.xlu0 %v1670_v1, %s1605_s12  ;;  %138 = vrot.lane.b32.xlu1 %v1679_v2, %s1605_s12 }
  0x1e   :  { %140 = vrot.lane.b32.xlu0 %v1665_v0, %s1605_s12  ;;  %134 = vrot.lane.b32.xlu1 %v1684_v3, %s1605_s12 }
  0x22   :  { %400 = vrot.lane.b32.xlu0 %v1670_v1, %s1606_s13  ;;  %402 = vrot.lane.b32.xlu1 %v1679_v2, %s1606_s13 }
  0x26   :  { %404 = vrot.lane.b32.xlu0 %v1665_v0, %s1606_s13  ;;  %398 = vrot.lane.b32.xlu1 %v1684_v3, %s1606_s13 }
  0x2a   :  { %88 = vrot.lane.b32.xlu0 %v1670_v1, %s1607_s14  ;;  %90 = vrot.lane.b32.xlu1 %v1679_v2, %s1607_s14 }
  0x2e   :  { %92 = vrot.lane.b32.xlu0 %v1665_v0, %s1607_s14  ;;  %86 = vrot.lane.b32.xlu1 %v1684_v3, %s1607_s14 }
  0x32   :  { %64 = vrot.lane.b32.xlu0 %v1670_v1, %s1608_s15  ;;  %66 = vrot.lane.b32.xlu1 %v1679_v2, %s1608_s15 }
  0x36   :  { %68 = vrot.lane.b32.xlu0 %v1665_v0, %s1608_s15  ;;  %62 = vrot.lane.b32.xlu1 %v1684_v3, %s1608_s15 }
  0x3a   :  { %40 = vrot.lane.b32.xlu0 %v1670_v1, %s1609_s16  ;;  %42 = vrot.lane.b32.xlu1 %v1679_v2, %s1609_s16 }
  0x3e   :  { %44 = vrot.lane.b32.xlu0 %v1665_v0, %s1609_s16  ;;  %38 = vrot.lane.b32.xlu1 %v1684_v3, %s1609_s16 }
  0x42   :  { %376 = vrot.lane.b32.xlu0 %v1670_v1, %s1610_s17  ;;  %378 = vrot.lane.b32.xlu1 %v1679_v2, %s1610_s17 }
  0x46   :  { %374 = vrot.lane.b32.xlu0 %v1684_v3, %s1610_s17  ;;  %352 = vrot.lane.b32.xlu1 %v1670_v1, %s1611_s18 }
  0x4a   :  { %354 = vrot.lane.b32.xlu0 %v1679_v2, %s1611_s18  ;;  %350 = vrot.lane.b32.xlu1 %v1684_v3, %s1611_s18 }
  0x4e   :  { %328 = vrot.lane.b32.xlu0 %v1670_v1, %s1612_s19  ;;  %330 = vrot.lane.b32.xlu1 %v1679_v2, %s1612_s19 }
  0x52   :  { %214 = vrot.lane.b32.xlu0 %v1765_v4, %s1602_s28  ;;  %216 = vrot.lane.b32.xlu1 %v1770_v5, %s1602_s28  ;;  %s1617_s28 = smov 124  }
  0x56   :  { %326 = vrot.lane.b32.xlu0 %v1684_v3, %s1612_s19  ;;  %304 = vrot.lane.b32.xlu1 %v1670_v1, %s1613_s24 }
  0x5a   :  { %306 = vrot.lane.b32.xlu0 %v1679_v2, %s1613_s24  ;;  %190 = vrot.lane.b32.xlu1 %v1765_v4, %s1603_s10 }
  0x5e   :  { %192 = vrot.lane.b32.xlu0 %v1770_v5, %s1603_s10  ;;  %302 = vrot.lane.b32.xlu1 %v1684_v3, %s1613_s24 }
  0x62   :  { %280 = vrot.lane.b32.xlu0 %v1670_v1, %s1614_s25  ;;  %282 = vrot.lane.b32.xlu1 %v1679_v2, %s1614_s25 }
  0x66   :  { %166 = vrot.lane.b32.xlu0 %v1765_v4, %s1604_s11  ;;  %168 = vrot.lane.b32.xlu1 %v1770_v5, %s1604_s11 }
  0x6a   :  { %278 = vrot.lane.b32.xlu0 %v1684_v3, %s1614_s25  ;;  %256 = vrot.lane.b32.xlu1 %v1670_v1, %s1615_s26 }
  0x6e   :  { %258 = vrot.lane.b32.xlu0 %v1679_v2, %s1615_s26  ;;  %142 = vrot.lane.b32.xlu1 %v1765_v4, %s1605_s12 }
  0x72   :  { %144 = vrot.lane.b32.xlu0 %v1770_v5, %s1605_s12  ;;  %254 = vrot.lane.b32.xlu1 %v1684_v3, %s1615_s26 }
  0x74   :  { %v1808_v6 = vpop.permute.xlu1 %212  ;;  %v209_v7 = vpop.permute.xlu0 %208 }
  0x76   :  { %232 = vrot.lane.b32.xlu0 %v1670_v1, %s1616_s27  ;;  %234 = vrot.lane.b32.xlu1 %v1679_v2, %s1616_s27 }
  0x78   :  { %v211_v8 = vpop.permute.xlu0 %210  ;;  %v207_v9 = vpop.permute.xlu1 %206 }
  0x79   :  { %v1853_v24 = vsel %vm218_vm0, %v209_v7, %v211_v8  ;;  %v1857_v25 = vsel %vm218_vm0, %v211_v8, %v1808_v6  ;;  %v1868_v28 = vsel %vm218_vm0, %v207_v9, %v209_v7 }
  0x7a   :  { %230 = vrot.lane.b32.xlu0 %v1684_v3, %s1616_s27  ;;  %406 = vrot.lane.b32.xlu1 %v1765_v4, %s1606_s13 }
  0x7c   :  { %v185_v10 = vpop.permute.xlu0 %184  ;;  %v187_v11 = vpop.permute.xlu1 %186 }
  0x7d   :  { %v1879_v31 = vsel %vm194_vm1, %v185_v10, %v187_v11 }
  0x7e   :  { %408 = vrot.lane.b32.xlu0 %v1770_v5, %s1606_s13  ;;  %94 = vrot.lane.b32.xlu1 %v1765_v4, %s1607_s14 }
  0x80   :  { %v1822_v12 = vpop.permute.xlu0 %188  ;;  %v183_v13 = vpop.permute.xlu1 %182 }
  0x81   :  { %v1891_v34 = vsel %vm194_vm1, %v187_v11, %v1822_v12  ;;  %v1894_v35 = vsel %vm194_vm1, %v183_v13, %v185_v10 }
  0x82   :  { %96 = vrot.lane.b32.xlu0 %v1770_v5, %s1607_s14  ;;  %70 = vrot.lane.b32.xlu1 %v1765_v4, %s1608_s15 }
  0x84   :  { %v161_v14 = vpop.permute.xlu0 %160  ;;  %v163_v15 = vpop.permute.xlu1 %162 }
  0x85   :  { %v1917_v41 = vsel %vm170_vm2, %v161_v14, %v163_v15 }
  0x86   :  { %72 = vrot.lane.b32.xlu0 %v1770_v5, %s1608_s15  ;;  %46 = vrot.lane.b32.xlu1 %v1765_v4, %s1609_s16 }
  0x88   :  { %v1832_v16 = vpop.permute.xlu0 %164  ;;  %v159_v17 = vpop.permute.xlu1 %158 }
  0x89   :  { %v1914_v40 = vsel %vm170_vm2, %v163_v15, %v1832_v16  ;;  %v1928_v44 = vsel %vm170_vm2, %v159_v17, %v161_v14 }
  0x8a   :  { %48 = vrot.lane.b32.xlu0 %v1770_v5, %s1609_s16  ;;  %112 = vrot.lane.b32.xlu1 %v1670_v1, %s1617_s28 }
  0x8c   :  { %v137_v18 = vpop.permute.xlu0 %136  ;;  %v139_v19 = vpop.permute.xlu1 %138 }
  0x8d   :  { %v1939_v47 = vsel %vm2730_vm3, %v137_v18, %v139_v19 }
  0x8e   :  { %114 = vrot.lane.b32.xlu0 %v1679_v2, %s1617_s28  ;;  %110 = vrot.lane.b32.xlu1 %v1684_v3, %s1617_s28 }
  0x90   :  { %v1842_v20 = vpop.permute.xlu0 %140  ;;  %v135_v21 = vpop.permute.xlu1 %134 }
  0x91   :  { %v1949_v50 = vsel %vm2730_vm3, %v139_v19, %v1842_v20  ;;  %v1952_v51 = vsel %vm2730_vm3, %v135_v21, %v137_v18 }
  0x92   :  { %380 = vrot.lane.b32.xlu0 %v1665_v0, %s1610_s17  ;;  %382 = vrot.lane.b32.xlu1 %v1765_v4, %s1610_s17 }
  0x94   :  { %v1848_v22 = vpop.permute.xlu0 %400  ;;  %v1850_v23 = vpop.permute.xlu1 %402 }
  0x95   :  { %v412_v59 = vsel %vm410_vm5, %v1848_v22, %v1850_v23 }
  0x96   :  { %514 = vrot.lane.b32.xlu0 %v1853_v24, %s1618_s29  ;;  %516 = vrot.lane.b32.xlu1 %v1857_v25, %s1618_s29 }
  0x98   :  { %v1863_v26 = vpop.permute.xlu0 %404  ;;  %v1865_v27 = vpop.permute.xlu1 %398 }
  0x99   :  { %v413_v58 = vsel %vm410_vm5, %v1850_v23, %v1863_v26  ;;  %v411_v7 = vsel %vm410_vm5, %v1865_v27, %v1848_v22 }
  0x9a   :  { %356 = vrot.lane.b32.xlu1 %v1665_v0, %s1611_s18  ;;  %512 = vrot.lane.b32.xlu0 %v1868_v28, %s1618_s29 }
  0x9c   :  { %v1874_v29 = vpop.permute.xlu0 %88  ;;  %v1876_v30 = vpop.permute.xlu1 %90 }
  0x9d   :  { %v1995_v11 = vsel %vm98_vm8, %v1874_v29, %v1876_v30 }
  0x9e   :  { %358 = vrot.lane.b32.xlu0 %v1765_v4, %s1611_s18  ;;  %502 = vrot.lane.b32.xlu1 %v1879_v31, %s1618_s29 }
  0xa0   :  { %v1885_v32 = vpop.permute.xlu0 %92  ;;  %v1887_v33 = vpop.permute.xlu1 %86 }
  0xa1   :  { %v2004_v15 = vsel %vm98_vm8, %v1887_v33, %v1874_v29  ;;  %v2009_v17 = vsel %vm98_vm8, %v1876_v30, %v1885_v32 }
  0xa2   :  { %504 = vrot.lane.b32.xlu0 %v1891_v34, %s1618_s29  ;;  %500 = vrot.lane.b32.xlu1 %v1894_v35, %s1618_s29 }
  0xa4   :  { %v1900_v36 = vpop.permute.xlu0 %64  ;;  %v1902_v37 = vpop.permute.xlu1 %66 }
  0xa5   :  { %v2036_v30 = vsel %vm74_vm10, %v1900_v36, %v1902_v37 }
  0xa6   :  { %332 = vrot.lane.b32.xlu0 %v1665_v0, %s1612_s19  ;;  %334 = vrot.lane.b32.xlu1 %v1765_v4, %s1612_s19 }
  0xa8   :  { %v1908_v38 = vpop.permute.xlu0 %68  ;;  %v1910_v39 = vpop.permute.xlu1 %62 }
  0xa9   :  { %v2031_v29 = vsel %vm74_vm10, %v1902_v37, %v1908_v38 }
  0xaa   :  { %492 = vrot.lane.b32.xlu1 %v1914_v40, %s1618_s29  ;;  %490 = vrot.lane.b32.xlu0 %v1917_v41, %s1618_s29 }
  0xac   :  { %v1923_v42 = vpop.permute.xlu0 %40  ;;  %v1925_v43 = vpop.permute.xlu1 %42 }
  0xad   :  { %v2053_v37 = vsel %vm50_vm11, %v1923_v42, %v1925_v43 }
  0xae   :  { %308 = vrot.lane.b32.xlu1 %v1665_v0, %s1613_s24  ;;  %488 = vrot.lane.b32.xlu0 %v1928_v44, %s1618_s29 }
  0xb0   :  { %v1934_v45 = vpop.permute.xlu0 %44  ;;  %v1936_v46 = vpop.permute.xlu1 %38 }
  0xb2   :  { %310 = vrot.lane.b32.xlu0 %v1765_v4, %s1613_s24  ;;  %478 = vrot.lane.b32.xlu1 %v1939_v47, %s1618_s29 }
  0xb4   :  { %v377_v48 = vpop.permute.xlu0 %376  ;;  %v1945_v49 = vpop.permute.xlu1 %378 }
  0xb5   :  { %v388_v52 = vsel %vm386_vm4, %v377_v48, %v1945_v49 }
  0xb6   :  { %480 = vrot.lane.b32.xlu0 %v1949_v50, %s1618_s29  ;;  %476 = vrot.lane.b32.xlu1 %v1952_v51, %s1618_s29 }
  0xb7   :  { %647 = vmatprep.subr.mxu0 %v388_v52 }
  0xb8   :  { %v375_v53 = vpop.permute.xlu0 %374  ;;  %v353_v54 = vpop.permute.xlu1 %352 }
  0xb9   :  { %v387_v55 = vsel %vm386_vm4, %v375_v53, %v377_v48  ;;  %v2048_v53 = vsel %vm74_vm10, %v1910_v39, %v1900_v36 }
  0xba   :  { %284 = vrot.lane.b32.xlu0 %v1665_v0, %s1614_s25  ;;  %286 = vrot.lane.b32.xlu1 %v1765_v4, %s1614_s25 }
  0xbb   :  { %648 = vmatpush1.msra.mxu0 %v387_v55  ;;  %v2064_v55 = vld [vmem:[%s2723_s1 + $0x8] sm:$0xff] }
  0xbc   :  { %v1965_v56 = vpop.permute.xlu0 %354  ;;  %v351_v57 = vpop.permute.xlu1 %350  ;;  %1533 = vmatprep.mubr.msk.f32.mxu0 %vm640_vm13, %v2064_v55  ;;  %1535 = vmatprep.mubr.msk.f32.mxu1 %vm640_vm13, %v2064_v55 }
  0xbd   :  { %v364_v60 = vsel %vm362_vm6, %v353_v54, %v1965_v56  ;;  %v363_v61 = vsel %vm362_vm6, %v351_v57, %v353_v54  ;;  %v2077_v57 = vsel %vm50_vm11, %v1936_v46, %v1923_v42 }
  0xbe   :  { %468 = vrot.lane.b32.xlu1 %v413_v58, %s1618_s29  ;;  %466 = vrot.lane.b32.xlu0 %v412_v59, %s1618_s29  ;;  %v2082_v58 = vsel %vm50_vm11, %v1925_v43, %v1934_v45 }
  0xbf   :  { %649 = vmatprep.subr.mxu0 %v364_v60 }
  0xc0   :  { %650 = vmatpush1.msra.mxu0 %v363_v61  ;;  %v329_v62 = vpop.permute.xlu0 %328  ;;  %v1978_v63 = vpop.permute.xlu1 %330 }
  0xc1   :  { %v340_v8 = vsel %vm338_vm7, %v329_v62, %v1978_v63 }
  0xc2   :  { %260 = vrot.lane.b32.xlu1 %v1665_v0, %s1615_s26  ;;  %464 = vrot.lane.b32.xlu0 %v411_v7, %s1618_s29 }
  0xc3   :  { %651 = vmatprep.subr.mxu0 %v340_v8 }
  0xc4   :  { %v1988_v9 = vpop.permute.xlu0 %214  ;;  %v1990_v10 = vpop.permute.xlu1 %216 }
  0xc6   :  { %262 = vrot.lane.b32.xlu0 %v1765_v4, %s1615_s26  ;;  %454 = vrot.lane.b32.xlu1 %v1995_v11, %s1618_s29 }
  0xc8   :  { %v327_v13 = vpop.permute.xlu0 %326  ;;  %v305_v14 = vpop.permute.xlu1 %304 }
  0xc9   :  { %v339_v18 = vsel %vm338_vm7, %v327_v13, %v329_v62 }
  0xca   :  { %456 = vrot.lane.b32.xlu0 %v2009_v17, %s1618_s29  ;;  %452 = vrot.lane.b32.xlu1 %v2004_v15, %s1618_s29 }
  0xcb   :  { %652 = vmatpush1.msra.mxu0 %v339_v18 }
  0xcc   :  { %v2016_v19 = vpop.permute.xlu0 %306  ;;  %v2018_v21 = vpop.permute.xlu1 %190 }
  0xcd   :  { %v316_v22 = vsel %vm314_vm9, %v305_v14, %v2016_v19 }
  0xce   :  { %236 = vrot.lane.b32.xlu0 %v1665_v0, %s1616_s27  ;;  %238 = vrot.lane.b32.xlu1 %v1765_v4, %s1616_s27 }
  0xcf   :  { %653 = vmatprep.subr.mxu0 %v316_v22 }
  0xd0   :  { %v2026_v23 = vpop.permute.xlu0 %192  ;;  %v303_v27 = vpop.permute.xlu1 %302 }
  0xd1   :  { %v315_v33 = vsel %vm314_vm9, %v303_v27, %v305_v14 }
  0xd2   :  { %444 = vrot.lane.b32.xlu1 %v2031_v29, %s1618_s29  ;;  %442 = vrot.lane.b32.xlu0 %v2036_v30, %s1618_s29 }
  0xd3   :  { %654 = vmatpush1.msra.mxu0 %v315_v33 }
  0xd4   :  { %v281_v48 = vpop.permute.xlu0 %280  ;;  %v2043_v52 = vpop.permute.xlu1 %282 }
  0xd5   :  { %v292_v54 = vsel %vm290_vm12, %v281_v48, %v2043_v52 }
  0xd6   :  { %440 = vrot.lane.b32.xlu0 %v2048_v53, %s1618_s29  ;;  %430 = vrot.lane.b32.xlu1 %v2053_v37, %s1618_s29 }
  0xd7   :  { %655 = vmatprep.subr.mxu0 %v292_v54 }
  0xd8   :  { %v2068_v36 = vpop.permute.xlu0 %166  ;;  %v2070_v39 = vpop.permute.xlu1 %168 }
  0xda   :  { %432 = vrot.lane.b32.xlu0 %v2082_v58, %s1618_s29  ;;  %428 = vrot.lane.b32.xlu1 %v2077_v57, %s1618_s29 }
  0xdc   :  { %v279_v59 = vpop.permute.xlu0 %278  ;;  %v257_v60 = vpop.permute.xlu1 %256 }
  0xdd   :  { %v291_v61 = vsel %vm290_vm12, %v279_v59, %v281_v48 }
  0xde   :  { %418 = vrot.lane.b32.xlu0 %v1670_v1, %s1618_s29  ;;  %420 = vrot.lane.b32.xlu1 %v1679_v2, %s1618_s29 }
  0xdf   :  { %656 = vmatpush1.msra.mxu0 %v291_v61 }
  0xe0   :  { %v2093_v42 = vpop.permute.xlu0 %258  ;;  %v143_v43 = vpop.permute.xlu1 %142 }
  0xe1   :  { %v268_v46 = vsel %vm266_vm14, %v257_v60, %v2093_v42 }
  0xe2   :  { %416 = vrot.lane.b32.xlu0 %v1684_v3, %s1618_s29  ;;  %384 = vrot.lane.b32.xlu1 %v1770_v5, %s1610_s17 }
  0xe3   :  { %657 = vmatprep.subr.mxu0 %v268_v46 }
  0xe4   :  { %v2101_v62 = vpop.permute.xlu0 %144  ;;  %v255_v7 = vpop.permute.xlu1 %254 }
  0xe5   :  { %v267_v2 = vsel %vm266_vm14, %v255_v7, %v257_v60  ;;  %v2193_v60 = vsel %vm2730_vm3, %v1842_v20, %v143_v43 }
  0xe6   :  { %360 = vrot.lane.b32.xlu0 %v1770_v5, %s1611_s18  ;;  %116 = vrot.lane.b32.xlu1 %v1665_v0, %s1617_s28 }
  0xe7   :  { %658 = vmatpush1.msra.mxu0 %v267_v2 }
  0xe8   :  { %v233_v8 = vpop.permute.xlu0 %232  ;;  %v2108_v13 = vpop.permute.xlu1 %234 }
  0xe9   :  { %v244_v14 = vsel %vm242_vm15, %v233_v8, %v2108_v13 }
  0xea   :  { %118 = vrot.lane.b32.xlu0 %v1765_v4, %s1617_s28  ;;  %336 = vrot.lane.b32.xlu1 %v1770_v5, %s1612_s19 }
  0xeb   :  { %659 = vmatprep.subr.mxu0 %v244_v14 }
  0xec   :  { %v231_v18 = vpop.permute.xlu0 %230  ;;  %v407_v22 = vpop.permute.xlu1 %406 }
  0xed   :  { %v243_v27 = vsel %vm242_vm15, %v231_v18, %v233_v8  ;;  %v414_v7 = vsel %vm410_vm5, %v1863_v26, %v407_v22 }
  0xee   :  { %312 = vrot.lane.b32.xlu0 %v1770_v5, %s1613_s24  ;;  %288 = vrot.lane.b32.xlu1 %v1770_v5, %s1614_s25 }
  0xef   :  { %660 = vmatpush1.msra.mxu0 %v243_v27 }
  0xf0   :  { %661 = vmatprep.subr.mxu0 %v1853_v24  ;;  %v2122_v33 = vpop.permute.xlu0 %408  ;;  %v2124_v48 = vpop.permute.xlu1 %94 }
  0xf1   :  { %662 = vmatpush1.msra.mxu0 %v1868_v28  ;;  %v2142_v28 = vsel %vm218_vm0, %v1808_v6, %v1988_v9  ;;  %v2162_v6 = vsel %vm194_vm1, %v1822_v12, %v2018_v21  ;;  %v2185_v12 = vsel %vm170_vm2, %v2068_v36, %v2070_v39  ;;  %v415_v8 = vsel %vm410_vm5, %v407_v22, %v2122_v33 }
  0xf2   :  { %663 = vmatprep.subr.mxu0 %v1879_v31  ;;  %264 = vrot.lane.b32.xlu0 %v1770_v5, %s1615_s26  ;;  %v2150_v31 = vsel %vm218_vm0, %v1988_v9, %v1990_v10  ;;  %v2178_v9 = vsel %vm170_vm2, %v1832_v16, %v2068_v36  ;;  %vm122_vm0 = vcmask 1014784   ;;  %v2200_v36 = vsel %vm2730_vm3, %v143_v43, %v2101_v62 }
  0xf3   :  { %240 = vrot.lane.b32.xlu1 %v1770_v5, %s1616_s27  ;;  %664 = vmatpush1.msra.mxu0 %v1894_v35  ;;  %vm524_vm3 = vcmask 646144   ;;  %vm2731_vm5 = vcmask 916480  }
  0xf4   :  { %665 = vmatprep.subr.mxu0 %v1917_v41  ;;  %v2134_v54 = vpop.permute.xlu0 %96  ;;  %v2136_v24 = vpop.permute.xlu1 %70 }
  0xf5   :  { %666 = vmatpush1.msra.mxu0 %v1928_v44  ;;  %v2167_v44 = vsel %vm194_vm1, %v2018_v21, %v2026_v23 }
  0xf6   :  { %667 = vmatprep.subr.mxu0 %v1939_v47  ;;  %518 = vrot.lane.b32.xlu0 %v2142_v28, %s1618_s29 }
  0xf7   :  { %520 = vrot.lane.b32.xlu1 %v2150_v31, %s1618_s29  ;;  %668 = vmatpush1.msra.mxu0 %v1952_v51 }
  0xf8   :  { %v2155_v35 = vpop.permute.xlu0 %72  ;;  %v2157_v41 = vpop.permute.xlu1 %46 }
  0xf9   :  { %v2259_v14 = vsel %vm74_vm10, %v2136_v24, %v2155_v35 }
  0xfa   :  { %506 = vrot.lane.b32.xlu0 %v2162_v6, %s1618_s29 }
  0xfb   :  { %508 = vrot.lane.b32.xlu1 %v2167_v44, %s1618_s29 }
  0xfc   :  { %v2173_v47 = vpop.permute.xlu0 %48  ;;  %v113_v51 = vpop.permute.xlu1 %112 }
  0xfe   :  { %494 = vrot.lane.b32.xlu0 %v2178_v9, %s1618_s29 }
  0xff   :  { %496 = vrot.lane.b32.xlu1 %v2185_v12, %s1618_s29 }
 0x100   :  { %v2189_v21 = vpop.permute.xlu0 %114  ;;  %v111_v59 = vpop.permute.xlu1 %110 }
 0x101   :  { %v124_v16 = vsel %vm122_vm0, %v113_v51, %v2189_v21  ;;  %v123_v61 = vsel %vm122_vm0, %v111_v59, %v113_v51 }
 0x102   :  { %482 = vrot.lane.b32.xlu0 %v2193_v60, %s1618_s29  ;;  %669 = vmatprep.subr.mxu0 %v124_v16 }
 0x103   :  { %484 = vrot.lane.b32.xlu1 %v2200_v36, %s1618_s29  ;;  %670 = vmatpush1.msra.mxu0 %v123_v61 }
 0x104   :  { %v381_v46 = vpop.permute.xlu0 %380  ;;  %671 = vmatprep.subr.mxu0 %v1995_v11  ;;  %v2207_v20 = vpop.permute.xlu1 %382 }
 0x105   :  { %672 = vmatpush1.msra.mxu0 %v2004_v15  ;;  %v390_v43 = vsel %vm386_vm4, %v381_v46, %v2207_v20  ;;  %v389_v2 = vsel %vm386_vm4, %v1945_v49, %v381_v46  ;;  %v2231_v49 = vsel %vm98_vm8, %v1885_v32, %v2124_v48 }
 0x106   :  { %470 = vrot.lane.b32.xlu0 %v414_v7, %s1618_s29  ;;  %673 = vmatprep.subr.mxu0 %v2036_v30 }
 0x107   :  { %472 = vrot.lane.b32.xlu1 %v415_v8, %s1618_s29  ;;  %724 = vmatprep.subr.mxu1 %v390_v43  ;;  %v1619_v43 = vmov 0  }
 0x108   :  { %674 = vmatpush1.msra.mxu0 %v2048_v53  ;;  %725 = vmatpush1.msra.mxu1 %v389_v2  ;;  %v515_v26 = vpop.permute.xlu0 %514  ;;  %v2222_v11 = vpop.permute.xlu1 %516 }
 0x109   :  { %675 = vmatprep.subr.mxu0 %v2053_v37  ;;  %v566_v30 = vsel %vm524_vm3, %v515_v26, %v2222_v11  ;;  %v2242_v37 = vsel %vm98_vm8, %v2124_v48, %v2134_v54  ;;  %1596 = vset.pattern.permute.xlu0 %v1619_v43  ;;  %vm2734_vm8 = vmmov %vm2731_vm5 }
 0x10a   :  { %676 = vmatpush1.msra.mxu0 %v2077_v57  ;;  %120 = vrot.lane.b32.xlu0 %v1770_v5, %s1617_s28 }
 0x10b   :  { %458 = vrot.lane.b32.xlu1 %v2231_v49, %s1618_s29  ;;  %677 = vmatprep.subr.mxu0 %v1670_v1  ;;  %v2250_v1 = vsel %vm74_vm10, %v1908_v38, %v2136_v24  ;;  %v2268_v38 = vsel %vm50_vm11, %v1934_v45, %v2157_v41  ;;  %v2279_v24 = vsel %vm50_vm11, %v2157_v41, %v2173_v47 }
 0x10c   :  { %678 = vmatpush1.msra.mxu0 %v1684_v3  ;;  %v513_v15 = vpop.permute.xlu0 %512  ;;  %v357_v53 = vpop.permute.xlu1 %356  ;;  %1597 = vset.pattern.permute.xlu1 %v1619_v43 }
 0x10d   :  { %693 = vmatprep.subr.mxu0 %v566_v30  ;;  %v565_v32 = vsel %vm524_vm3, %v513_v15, %v515_v26  ;;  %v365_v22 = vsel %vm362_vm6, %v1965_v56, %v357_v53 }
 0x10e   :  { %460 = vrot.lane.b32.xlu0 %v2242_v37, %s1618_s29  ;;  %694 = vmatpush2.msra.mxu0 %v565_v32 }
 0x10f   :  { %446 = vrot.lane.b32.xlu1 %v2250_v1, %s1618_s29 }
 0x110   :  { %v2254_v3 = vpop.permute.xlu0 %358  ;;  %v503_v57 = vpop.permute.xlu1 %502 }
 0x111   :  { %v366_v18 = vsel %vm362_vm6, %v357_v53, %v2254_v3 }
 0x112   :  { %448 = vrot.lane.b32.xlu0 %v2259_v14, %s1618_s29  ;;  %726 = vmatprep.subr.mxu1 %v366_v18 }
 0x113   :  { %434 = vrot.lane.b32.xlu1 %v2268_v38, %s1618_s29  ;;  %727 = vmatpush1.msra.mxu1 %v365_v22  ;;  %v628_v22 = vld [vmem:[%s2724_s2] sm:$0xff] }
 0x114   :  { %v2274_v27 = vpop.permute.xlu0 %504  ;;  %v501_v48 = vpop.permute.xlu1 %500 }
 0x115   :  { %v561_v45 = vsel %vm524_vm3, %v503_v57, %v2274_v27  ;;  %v560_v51 = vsel %vm524_vm3, %v501_v48, %v503_v57 }
 0x116   :  { %436 = vrot.lane.b32.xlu0 %v2279_v24, %s1618_s29  ;;  %695 = vmatprep.subr.mxu0 %v561_v45 }
 0x117   :  { %422 = vrot.lane.b32.xlu1 %v1665_v0, %s1618_s29  ;;  %696 = vmatpush2.msra.mxu0 %v560_v51 }
 0x118   :  { %v333_v56 = vpop.permute.xlu0 %332  ;;  %v2288_v59 = vpop.permute.xlu1 %334 }
 0x119   :  { %v342_v41 = vsel %vm338_vm7, %v333_v56, %v2288_v59  ;;  %v341_v16 = vsel %vm338_vm7, %v1978_v63, %v333_v56  ;;  %v891_v56 = vld [vmem:[%s2725_s4] sm:$0xff] }
 0x11a   :  { %424 = vrot.lane.b32.xlu0 %v1765_v4, %s1618_s29  ;;  %728 = vmatprep.subr.mxu1 %v342_v41 }
 0x11b   :  { %522 = vrot.lane.b32.xlu1 %v1990_v10, %s1618_s29  ;;  %729 = vmatpush1.msra.mxu1 %v341_v16 }
 0x11c   :  { %v491_v61 = vpop.permute.xlu0 %490  ;;  %v2298_v0 = vpop.permute.xlu1 %492 }
 0x11d   :  { %v556_v46 = vsel %vm524_vm3, %v491_v61, %v2298_v0 }
 0x11e   :  { %510 = vrot.lane.b32.xlu0 %v2026_v23, %s1618_s29  ;;  %697 = vmatprep.subr.mxu0 %v556_v46 }
 0x11f   :  { %498 = vrot.lane.b32.xlu1 %v2070_v39, %s1618_s29 }
 0x120   :  { %v489_v63 = vpop.permute.xlu0 %488  ;;  %v309_v4 = vpop.permute.xlu1 %308 }
 0x121   :  { %v555_v7 = vsel %vm524_vm3, %v489_v63, %v491_v61  ;;  %v317_v15 = vsel %vm314_vm9, %v2016_v19, %v309_v4  ;;  %v629_v19 = vld [vmem:[%s2724_s2 + $0x8] sm:$0xff] }
 0x122   :  { %486 = vrot.lane.b32.xlu0 %v2101_v62, %s1618_s29  ;;  %698 = vmatpush2.msra.mxu0 %v555_v7 }
 0x123   :  { %474 = vrot.lane.b32.xlu1 %v2122_v33, %s1618_s29 }
 0x124   :  { %v2311_v2 = vpop.permute.xlu0 %310  ;;  %v479_v8 = vpop.permute.xlu1 %478 }
 0x125   :  { %v318_v26 = vsel %vm314_vm9, %v309_v4, %v2311_v2 }
 0x126   :  { %462 = vrot.lane.b32.xlu0 %v2134_v54, %s1618_s29  ;;  %730 = vmatprep.subr.mxu1 %v318_v26 }
 0x127   :  { %450 = vrot.lane.b32.xlu1 %v2155_v35, %s1618_s29  ;;  %731 = vmatpush1.msra.mxu1 %v317_v15 }
 0x128   :  { %v2321_v30 = vpop.permute.xlu0 %480  ;;  %v477_v33 = vpop.permute.xlu1 %476 }
 0x129   :  { %v551_v53 = vsel %vm524_vm3, %v479_v8, %v2321_v30  ;;  %v550_v32 = vsel %vm524_vm3, %v477_v33, %v479_v8 }
 0x12a   :  { %438 = vrot.lane.b32.xlu0 %v2173_v47, %s1618_s29  ;;  %699 = vmatprep.subr.mxu0 %v551_v53 }
 0x12b   :  { %426 = vrot.lane.b32.xlu1 %v1770_v5, %s1618_s29  ;;  %700 = vmatpush2.msra.mxu0 %v550_v32 }
 0x12c   :  { %v285_v57 = vpop.permute.xlu0 %284  ;;  %v2333_v18 = vpop.permute.xlu1 %286 }
 0x12d   :  { %v294_v48 = vsel %vm290_vm12, %v285_v57, %v2333_v18  ;;  %v293_v45 = vsel %vm290_vm12, %v2043_v52, %v285_v57 }
 0x12e   :  { %732 = vmatprep.subr.mxu1 %v294_v48  ;;  %637 = vperm.xlu0 %1596, %v629_v19  }
 0x12f   :  { %733 = vmatpush1.msra.mxu1 %v293_v45  ;;  %632 = vperm.xlu1 %1597, %v628_v22  }
 0x130   :  { %v467_v5 = vpop.permute.xlu0 %466  ;;  %v2342_v51 = vpop.permute.xlu1 %468 }
 0x131   :  { %v546_v41 = vsel %vm524_vm3, %v467_v5, %v2342_v51 }
 0x132   :  { %701 = vmatprep.subr.mxu0 %v546_v41 }
 0x133   :  { %894 = vperm.xlu1 %1597, %v891_v56  }
 0x134   :  { %v465_v16 = vpop.permute.xlu0 %464  ;;  %v261_v61 = vpop.permute.xlu1 %260 }
 0x135   :  { %v545_v52 = vsel %vm524_vm3, %v465_v16, %v467_v5  ;;  %v269_v7 = vsel %vm266_vm14, %v2093_v42, %v261_v61  ;;  %v2398_v16 = vld [vmem:[%s2723_s1 + $0x18] sm:$0xff] }
 0x136   :  { %702 = vmatpush2.msra.mxu0 %v545_v52 }
 0x138   :  { %v2350_v46 = vpop.permute.xlu0 %262  ;;  %v455_v63 = vpop.permute.xlu1 %454 }
 0x139   :  { %v270_v4 = vsel %vm266_vm14, %v261_v61, %v2350_v46 }
 0x13a   :  { %734 = vmatprep.subr.mxu1 %v270_v4  ;;  %v2408_v4 = vld [vmem:[%s2723_s1 + $0x10] sm:$0xff] }
 0x13b   :  { %735 = vmatpush1.msra.mxu1 %v269_v7 }
 0x13c   :  { %v2356_v43 = vpop.permute.xlu0 %456  ;;  %v453_v8 = vpop.permute.xlu1 %452 }
 0x13d   :  { %v541_v26 = vsel %vm524_vm3, %v455_v63, %v2356_v43  ;;  %v540_v15 = vsel %vm524_vm3, %v453_v8, %v455_v63 }
 0x13e   :  { %703 = vmatprep.subr.mxu0 %v541_v26 }
 0x13f   :  { %704 = vmatpush2.msra.mxu0 %v540_v15 }
 0x140   :  { %v237_v33 = vpop.permute.xlu0 %236  ;;  %v2361_v53 = vpop.permute.xlu1 %238 }
 0x141   :  { %v246_v32 = vsel %vm242_vm15, %v237_v33, %v2361_v53  ;;  %v245_v42 = vsel %vm242_vm15, %v2108_v13, %v237_v33 }
 0x142   :  { %736 = vmatprep.subr.mxu1 %v246_v32 }
 0x143   :  { %737 = vmatpush1.msra.mxu1 %v245_v42 }
 0x144   :  { %v443_v19 = vpop.permute.xlu0 %442  ;;  %738 = vmatprep.subr.mxu1 %v2142_v28  ;;  %v2368_v57 = vpop.permute.xlu1 %444 }
 0x145   :  { %739 = vmatpush1.msra.mxu1 %v1857_v25  ;;  %v536_v22 = vsel %vm524_vm3, %v443_v19, %v2368_v57 }
 0x146   :  { %705 = vmatprep.subr.mxu0 %v536_v22  ;;  %740 = vmatprep.subr.mxu1 %v2162_v6 }
 0x147   :  { %741 = vmatpush1.msra.mxu1 %v1891_v34 }
 0x148   :  { %v441_v48 = vpop.permute.xlu0 %440  ;;  %742 = vmatprep.subr.mxu1 %v2178_v9  ;;  %v431_v13 = vpop.permute.xlu1 %430 }
 0x149   :  { %743 = vmatpush1.msra.mxu1 %v1914_v40  ;;  %v535_v28 = vsel %vm524_vm3, %v441_v48, %v443_v19 }
 0x14a   :  { %706 = vmatpush2.msra.mxu0 %v535_v28  ;;  %744 = vmatprep.subr.mxu1 %v2193_v60 }
 0x14b   :  { %745 = vmatpush1.msra.mxu1 %v1949_v50  ;;  %v2392_v50 = vld [vmem:[%s2723_s1] sm:$0xff] }
 0x14c   :  { %v2380_v25 = vpop.permute.xlu0 %432  ;;  %v429_v45 = vpop.permute.xlu1 %428 }
 0x14d   :  { %v531_v6 = vsel %vm524_vm3, %v431_v13, %v2380_v25  ;;  %v530_v34 = vsel %vm524_vm3, %v429_v45, %v431_v13 }
 0x14e   :  { %707 = vmatprep.subr.mxu0 %v531_v6 }
 0x14f   :  { %708 = vmatpush2.msra.mxu0 %v530_v34 }
 0x150   :  { %v419_v9 = vpop.permute.xlu0 %418  ;;  %v2385_v5 = vpop.permute.xlu1 %420 }
 0x151   :  { %v526_v40 = vsel %vm524_vm3, %v419_v9, %v2385_v5 }
 0x152   :  { %709 = vmatprep.subr.mxu0 %v526_v40 }
 0x154   :  { %v417_v60 = vpop.permute.xlu0 %416  ;;  %v385_v56 = vpop.permute.xlu1 %384 }
 0x155   :  { %v525_v41 = vsel %vm524_vm3, %v417_v60, %v419_v9  ;;  %v391_v61 = vsel %vm386_vm4, %v2207_v20, %v385_v56  ;;  %vm1621_vm4 = vmmov 0  }
 0x156   :  { %710 = vmatpush2.msra.mxu0 %v525_v41 }
 0x157   :  { %712 = vmatmul.mubr.f32.vlgmr.msra.gmra.mxu0 %v2392_v50  ;;  %801 = vmatprep.subr.mxu0 %v385_v56 }
 0x158   :  { %v361_v52 = vpop.permute.xlu0 %360  ;;  %802 = vmatpush1.msra.mxu0 %v391_v61  ;;  %v117_v63 = vpop.permute.xlu1 %116  ;;  %1534 = vmatprep.mubr.msk.f32.mxu0 %vm640_vm13, %v2398_v16 }
 0x159   :  { %v367_v7 = vsel %vm362_vm6, %v2254_v3, %v361_v52  ;;  %803 = vmatprep.subr.mxu0 %v361_v52  ;;  %v125_v3 = vsel %vm122_vm0, %v2189_v21, %v117_v63  ;;  %vm2732_vm6 = vmmov %vm2731_vm5 }
 0x15a   :  { %804 = vmatpush1.msra.mxu0 %v367_v7 }
 0x15b   :  { %718 = vmatmul.mubr.f32.gmra.mxu0 %v2408_v4 }
 0x15c   :  { %v2413_v20 = vpop.permute.xlu0 %118  ;;  %v337_v8 = vpop.permute.xlu1 %336  ;;  %1537 = vmatprep.mubr.msk.f32.mxu0 %vm640_vm13, %v2064_v55 }
 0x15d   :  { %v343_v26 = vsel %vm338_vm7, %v2288_v59, %v337_v8  ;;  %805 = vmatprep.subr.mxu0 %v337_v8  ;;  %v126_v15 = vsel %vm122_vm0, %v117_v63, %v2413_v20  ;;  %vm2733_vm7 = vmmov %vm2731_vm5 }
 0x15e   :  { %746 = vmatprep.subr.mxu1 %v126_v15  ;;  %806 = vmatpush1.msra.mxu0 %v343_v26 }
 0x15f   :  { %747 = vmatpush1.msra.mxu1 %v125_v3 }
 0x160   :  { %v313_v33 = vpop.permute.xlu0 %312  ;;  %748 = vmatprep.subr.mxu1 %v2231_v49  ;;  %v289_v32 = vpop.permute.xlu1 %288 }
 0x161   :  { %v319_v55 = vsel %vm314_vm9, %v2311_v2, %v313_v33  ;;  %749 = vmatpush1.msra.mxu1 %v2009_v17  ;;  %807 = vmatprep.subr.mxu0 %v313_v33  ;;  %v295_v59 = vsel %vm290_vm12, %v2333_v18, %v289_v32  ;;  %v1598_v17 = vld [vmem:[%s2722_s0 + $0x18] sm:$0xff] }
 0x162   :  { %750 = vmatprep.subr.mxu1 %v2250_v1  ;;  %808 = vmatpush1.msra.mxu0 %v319_v55  ;;  %v1599_v1 = vld [vmem:[%s2722_s0 + $0x10] sm:$0xff] }
 0x163   :  { %751 = vmatpush1.msra.mxu1 %v2031_v29  ;;  %809 = vmatprep.subr.mxu0 %v289_v32 }
 0x164   :  { %v265_v21 = vpop.permute.xlu0 %264  ;;  %752 = vmatprep.subr.mxu1 %v2268_v38  ;;  %810 = vmatpush1.msra.mxu0 %v295_v59 }
 0x165   :  { %v271_v49 = vsel %vm266_vm14, %v2350_v46, %v265_v21  ;;  %v241_v2 = vpop.permute.xlu1 %240  ;;  %753 = vmatpush1.msra.mxu1 %v2082_v58  ;;  %811 = vmatprep.subr.mxu0 %v265_v21 }
 0x166   :  { %812 = vmatpush1.msra.mxu0 %v271_v49  ;;  %754 = vmatprep.subr.mxu1 %v1598_v17  ;;  %v247_v29 = vsel %vm242_vm15, %v2361_v53, %v241_v2  ;;  %v1620_v17 = vmov 0.0  }
 0x167   :  { %813 = vmatprep.subr.mxu0 %v241_v2  ;;  %755 = vmatpush1.msra.mxu1 %v1599_v1 }
 0x168   :  { %v519_v38 = vpop.permute.xlu0 %518  ;;  %814 = vmatpush1.msra.mxu0 %v247_v29 }
 0x169   :  { %v2443_v18 = vpop.permute.xlu1 %520  ;;  %815 = vmatprep.subr.mxu0 %v1990_v10  ;;  %v567_v58 = vsel %vm524_vm3, %v2222_v11, %v519_v38 }
 0x16a   :  { %v568_v46 = vsel %vm524_vm3, %v519_v38, %v2443_v18  ;;  %816 = vmatpush1.msra.mxu0 %v2150_v31 }
 0x16b   :  { %770 = vmatprep.subr.mxu1 %v568_v46  ;;  %817 = vmatprep.subr.mxu0 %v2026_v23 }
 0x16c   :  { %771 = vmatpush2.msra.mxu1 %v567_v58  ;;  %v507_v53 = vpop.permute.xlu0 %506  ;;  %818 = vmatpush1.msra.mxu0 %v2167_v44 }
 0x16d   :  { %v2453_v42 = vpop.permute.xlu1 %508  ;;  %819 = vmatprep.subr.mxu0 %v2070_v39  ;;  %v562_v10 = vsel %vm524_vm3, %v2274_v27, %v507_v53 }
 0x16e   :  { %v563_v11 = vsel %vm524_vm3, %v507_v53, %v2453_v42  ;;  %820 = vmatpush1.msra.mxu0 %v2185_v12 }
 0x16f   :  { %772 = vmatprep.subr.mxu1 %v563_v11  ;;  %821 = vmatprep.subr.mxu0 %v2101_v62 }
 0x170   :  { %773 = vmatpush2.msra.mxu1 %v562_v10  ;;  %v495_v23 = vpop.permute.xlu0 %494  ;;  %822 = vmatpush1.msra.mxu0 %v2200_v36 }
 0x171   :  { %v2463_v31 = vpop.permute.xlu1 %496  ;;  %v557_v39 = vsel %vm524_vm3, %v2298_v0, %v495_v23 }
 0x172   :  { %v558_v44 = vsel %vm524_vm3, %v495_v23, %v2463_v31 }
 0x173   :  { %774 = vmatprep.subr.mxu1 %v558_v44 }
 0x174   :  { %775 = vmatpush2.msra.mxu1 %v557_v39  ;;  %v483_v27 = vpop.permute.xlu0 %482 }
 0x175   :  { %v2469_v19 = vpop.permute.xlu1 %484  ;;  %v552_v62 = vsel %vm524_vm3, %v2321_v30, %v483_v27 }
 0x176   :  { %v553_v12 = vsel %vm524_vm3, %v483_v27, %v2469_v19 }
 0x177   :  { %776 = vmatprep.subr.mxu1 %v553_v12 }
 0x178   :  { %777 = vmatpush2.msra.mxu1 %v552_v62  ;;  %v471_v36 = vpop.permute.xlu0 %470 }
 0x179   :  { %v2475_v22 = vpop.permute.xlu1 %472  ;;  %v547_v0 = vsel %vm524_vm3, %v2342_v51, %v471_v36 }
 0x17a   :  { %v548_v48 = vsel %vm524_vm3, %v471_v36, %v2475_v22 }
 0x17b   :  { %778 = vmatprep.subr.mxu1 %v548_v48 }
 0x17c   :  { %779 = vmatpush2.msra.mxu1 %v547_v0  ;;  %v121_v13 = vpop.permute.xlu0 %120 }
 0x17d   :  { %v127_v30 = vsel %vm122_vm0, %v2413_v20, %v121_v13  ;;  %v459_v28 = vpop.permute.xlu1 %458  ;;  %823 = vmatprep.subr.mxu0 %v121_v13 }
 0x17e   :  { %824 = vmatpush1.msra.mxu0 %v127_v30  ;;  %v542_v34 = vsel %vm524_vm3, %v2356_v43, %v459_v28  ;;  %v1601_v43 = vld [vmem:[%s2722_s0 + $0x20] sm:$0xff] }
 0x17f   :  { %825 = vmatprep.subr.mxu0 %v2134_v54 }
 0x180   :  { %v461_v45 = vpop.permute.xlu0 %460  ;;  %826 = vmatpush1.msra.mxu0 %v2242_v37 }
 0x181   :  { %v447_v6 = vpop.permute.xlu1 %446  ;;  %827 = vmatprep.subr.mxu0 %v2155_v35  ;;  %v543_v51 = vsel %vm524_vm3, %v459_v28, %v461_v45  ;;  %v1600_v35 = vld [vmem:[%s2722_s0 + $0x28] sm:$0xff] }
 0x182   :  { %780 = vmatprep.subr.mxu1 %v543_v51  ;;  %828 = vmatpush1.msra.mxu0 %v2259_v14  ;;  %v537_v14 = vsel %vm524_vm3, %v2368_v57, %v447_v6 }
 0x183   :  { %781 = vmatpush2.msra.mxu1 %v542_v34  ;;  %829 = vmatprep.subr.mxu0 %v2173_v47 }
 0x184   :  { %v449_v9 = vpop.permute.xlu0 %448  ;;  %830 = vmatpush1.msra.mxu0 %v2279_v24 }
 0x185   :  { %v435_v54 = vpop.permute.xlu1 %434  ;;  %v538_v37 = vsel %vm524_vm3, %v447_v6, %v449_v9  ;;  %831 = vmatprep.subr.mxu0 %v1600_v35 }
 0x186   :  { %782 = vmatprep.subr.mxu1 %v538_v37  ;;  %832 = vmatpush1.msra.mxu0 %v1601_v43  ;;  %v532_v60 = vsel %vm524_vm3, %v2380_v25, %v435_v54 }
 0x187   :  { %783 = vmatpush2.msra.mxu1 %v537_v14 }
 0x188   :  { %v437_v47 = vpop.permute.xlu0 %436 }
 0x189   :  { %v423_v24 = vpop.permute.xlu1 %422  ;;  %v533_v40 = vsel %vm524_vm3, %v435_v54, %v437_v47 }
 0x18a   :  { %784 = vmatprep.subr.mxu1 %v533_v40  ;;  %v527_v52 = vsel %vm524_vm3, %v2385_v5, %v423_v24 }
 0x18b   :  { %785 = vmatpush2.msra.mxu1 %v532_v60 }
 0x18c   :  { %v425_v56 = vpop.permute.xlu0 %424 }
 0x18d   :  { %v523_v41 = vpop.permute.xlu1 %522  ;;  %v528_v61 = vsel %vm524_vm3, %v423_v24, %v425_v56 }
 0x18e   :  { %v569_v57 = vsel %vm524_vm3, %v2443_v18, %v523_v41  ;;  %847 = vmatprep.subr.mxu0 %v523_v41  ;;  %786 = vmatprep.subr.mxu1 %v528_v61 }
 0x18f   :  { %848 = vmatpush2.msra.mxu0 %v569_v57  ;;  %787 = vmatpush2.msra.mxu1 %v527_v52 }
 0x190   :  { %v511_v63 = vpop.permute.xlu0 %510  ;;  %789 = vmatmul.mubr.f32.vlgmr.msra.gmra.mxu1 %v2392_v50 }
 0x191   :  { %v564_v25 = vsel %vm524_vm3, %v2453_v42, %v511_v63  ;;  %v499_v7 = vpop.permute.xlu1 %498  ;;  %849 = vmatprep.subr.mxu0 %v511_v63  ;;  %1536 = vmatprep.mubr.msk.f32.mxu1 %vm640_vm13, %v2398_v16 }
 0x192   :  { %850 = vmatpush2.msra.mxu0 %v564_v25  ;;  %v559_v20 = vsel %vm524_vm3, %v2463_v31, %v499_v7 }
 0x193   :  { %851 = vmatprep.subr.mxu0 %v499_v7 }
 0x194   :  { %v487_v8 = vpop.permute.xlu0 %486  ;;  %795 = vmatmul.mubr.f32.gmra.mxu1 %v2408_v4  ;;  %852 = vmatpush2.msra.mxu0 %v559_v20 }
 0x195   :  { %v554_v5 = vsel %vm524_vm3, %v2469_v19, %v487_v8  ;;  %v475_v26 = vpop.permute.xlu1 %474  ;;  %853 = vmatprep.subr.mxu0 %v487_v8  ;;  %965 = vmatprep.mubr.f32.mxu1 %v1620_v17 }
 0x196   :  { %854 = vmatpush2.msra.mxu0 %v554_v5  ;;  %v549_v15 = vsel %vm524_vm3, %v2475_v22, %v475_v26 }
 0x197   :  { %855 = vmatprep.subr.mxu0 %v475_v26 }
 0x198   :  { %v463_v3 = vpop.permute.xlu0 %462  ;;  %856 = vmatpush2.msra.mxu0 %v549_v15 }
 0x199   :  { %v544_v33 = vsel %vm524_vm3, %v461_v45, %v463_v3  ;;  %v451_v32 = vpop.permute.xlu1 %450  ;;  %857 = vmatprep.subr.mxu0 %v463_v3 }
 0x19a   :  { %858 = vmatpush2.msra.mxu0 %v544_v33  ;;  %v539_v55 = vsel %vm524_vm3, %v449_v9, %v451_v32 }
 0x19b   :  { %859 = vmatprep.subr.mxu0 %v451_v32 }
 0x19c   :  { %v439_v59 = vpop.permute.xlu0 %438  ;;  %860 = vmatpush2.msra.mxu0 %v539_v55  ;;  %v1303_v55 = vld [vmem:[%s2727_s6] sm:$0xff] }
 0x19d   :  { %v534_v21 = vsel %vm524_vm3, %v437_v47, %v439_v59  ;;  %v427_v49 = vpop.permute.xlu1 %426  ;;  %861 = vmatprep.subr.mxu0 %v439_v59 }
 0x19e   :  { %862 = vmatpush2.msra.mxu0 %v534_v21  ;;  %v529_v2 = vsel %vm524_vm3, %v425_v56, %v427_v49  ;;  %vm897_vm3 = vcmask 130048  }
 0x19f   :  { %863 = vmatprep.subr.mxu0 %v427_v49 }
 0x1a0   :  { %864 = vmatpush2.msra.mxu0 %v529_v2 }
 0x1a1   :  { %866 = vmatmul.mubr.f32.vlgmr.msra.gmra.mxu0 %v2392_v50  ;;  %1555 = vmatprep.subr.mxu0 %v1620_v17 }
 0x1a2   :  { %1538 = vmatprep.mubr.msk.f32.mxu0 %vm640_vm13, %v2398_v16 }
 0x1a5   :  { %872 = vmatmul.mubr.f32.gmra.mxu0 %v2408_v4  ;;  %v890_v4 = vld [vmem:[%s2726_s3] sm:$0xff] }
 0x1a6   :  { %1573 = vmatprep.mubr.msk.f32.mxu0 %vm1621_vm4, %v1620_v17 }
 0x1a9   :  { %v638_v1 = vpop.permute.xlu0 %637 }
 0x1aa   :  { %v633_v18 = vpop.permute.xlu1 %632 }
 0x1ae   :  { %v895_v24 = vpop.permute.xlu1 %894 }
 0x217   :  { %v713_v29 = vpop.f32.mrf.mxu0 }
 0x218   :  { %v714_v10 = vadd.f32 %v713_v29, %v633_v18 }
 0x219   :  { %v715_v38 = vpop.f32.mrf.mxu0 }
 0x21a   :  { %v716_v53 = vadd.f32 %v715_v38, %v633_v18  ;;  %v878_v31 = vmax.f32 %v714_v10, 0.0 }
 0x21b   :  { %v719_v58 = vpop.f32.mrf.mxu0 }
 0x21c   :  { %v720_v46 = vadd.f32 %v719_v58, %v638_v1  ;;  %v879_v16 = vmax.f32 %v716_v53, 0.0 }
 0x21d   :  { %v721_v42 = vpop.f32.mrf.mxu0 }
 0x21e   :  { %v722_v50 = vadd.f32 %v721_v42, %v638_v1  ;;  %v884_v11 = vmax.f32 %v720_v46, 0.0 }
 0x220   :  { %v885_v23 = vmax.f32 %v722_v50, 0.0 }
 0x222   :  { %929 = vmatprep.subr.mxu1 %v885_v23 }
 0x223   :  { %930 = vmatpush1.msra.mxu1 %v884_v11 }
 0x224   :  { %931 = vmatprep.subr.mxu1 %v879_v16 }
 0x225   :  { %932 = vmatpush1.msra.mxu1 %v878_v31 }
 0x226   :  { %1539 = vmatmul.mubr.msk.f32.vlgmr.msra.gmra.mxu1 %vm897_vm3, %v890_v4 }
 0x227   :  { %1036 = vmatprep.mubr.f32.mxu1 %v1620_v17 }
 0x250   :  { %v790_v39 = vpop.f32.mrf.mxu1 }
 0x251   :  { %v791_v22 = vadd.f32 %v790_v39, %v633_v18 }
 0x252   :  { %v792_v44 = vpop.f32.mrf.mxu1 }
 0x253   :  { %v793_v12 = vadd.f32 %v792_v44, %v633_v18  ;;  %v880_v30 = vmax.f32 %v791_v22, 0.0 }
 0x254   :  { %v796_v27 = vpop.f32.mrf.mxu1 }
 0x255   :  { %v797_v19 = vadd.f32 %v796_v27, %v638_v1  ;;  %v881_v13 = vmax.f32 %v793_v12, 0.0 }
 0x256   :  { %v798_v62 = vpop.f32.mrf.mxu1 }
 0x257   :  { %v799_v36 = vadd.f32 %v798_v62, %v638_v1  ;;  %v886_v48 = vmax.f32 %v797_v19, 0.0 }
 0x259   :  { %v887_v0 = vmax.f32 %v799_v36, 0.0 }
 0x25b   :  { %1000 = vmatprep.subr.mxu1 %v887_v0 }
 0x25c   :  { %1001 = vmatpush1.msra.mxu1 %v886_v48 }
 0x25d   :  { %1002 = vmatprep.subr.mxu1 %v881_v13 }
 0x25e   :  { %1003 = vmatpush1.msra.mxu1 %v880_v30 }
 0x25f   :  { %1540 = vmatmul.mubr.msk.f32.vlgmr.msra.gmra.mxu1 %vm897_vm3, %v890_v4 }
 0x260   :  { %1107 = vmatprep.mubr.f32.mxu1 %v1620_v17 }
 0x261   :  { %v867_v28 = vpop.f32.mrf.mxu0 }
 0x262   :  { %v868_v37 = vadd.f32 %v867_v28, %v633_v18 }
 0x263   :  { %v869_v45 = vpop.f32.mrf.mxu0 }
 0x264   :  { %v870_v9 = vadd.f32 %v869_v45, %v633_v18  ;;  %v882_v47 = vmax.f32 %v868_v37, 0.0 }
 0x265   :  { %v873_v6 = vpop.f32.mrf.mxu0 }
 0x266   :  { %v874_v51 = vadd.f32 %v873_v6, %v638_v1  ;;  %v883_v43 = vmax.f32 %v870_v9, 0.0 }
 0x267   :  { %v875_v34 = vpop.f32.mrf.mxu0 }
 0x268   :  { %v876_v54 = vadd.f32 %v875_v34, %v638_v1  ;;  %v888_v14 = vmax.f32 %v874_v51, 0.0 }
 0x26a   :  { %v889_v35 = vmax.f32 %v876_v54, 0.0 }
 0x26c   :  { %1071 = vmatprep.subr.mxu1 %v889_v35 }
 0x26d   :  { %1072 = vmatpush1.msra.mxu1 %v888_v14 }
 0x26e   :  { %1073 = vmatprep.subr.mxu1 %v883_v43 }
 0x26f   :  { %1074 = vmatpush1.msra.mxu1 %v882_v47  ;;  %v2661_v47 = vld [vmem:[%s2728_s5] sm:$0xff] }
 0x270   :  { %1541 = vmatmul.mubr.msk.f32.vlgmr.msra.gmra.mxu1 %vm897_vm3, %v890_v4 }
 0x271   :  { %1376 = vmatprep.mubr.f32.mxu1 %v1620_v17 }
 0x2e6   :  { %v967_v40 = vpop.f32.mrf.mxu1 }
 0x2e7   :  { %v968_v60 = vadd.f32 %v967_v40, %v895_v24 }
 0x2e8   :  { %v969_v41 = vpop.f32.mrf.mxu1 }
 0x2e9   :  { %v2540_v56 = vmax.f32 %v968_v60, 0.0  ;;  %v970_v61 = vadd.f32 %v969_v41, %v895_v24 }
 0x2eb   :  { %1258 = vrot.lane.b32.xlu1 %v2540_v56, %s1614_s25  ;;  %1280 = vrot.lane.b32.xlu0 %v2540_v56, %s1613_s24  ;;  %v2558_v57 = vmax.f32 %v970_v61, 0.0 }
 0x2ef   :  { %1214 = vrot.lane.b32.xlu1 %v2540_v56, %s1603_s10  ;;  %1236 = vrot.lane.b32.xlu0 %v2540_v56, %s1615_s26 }
 0x2f3   :  { %1170 = vrot.lane.b32.xlu1 %v2540_v56, %s1605_s12  ;;  %1192 = vrot.lane.b32.xlu0 %v2540_v56, %s1604_s11 }
 0x2f7   :  { %1126 = vrot.lane.b32.xlu1 %v2540_v56, %s1609_s16  ;;  %1148 = vrot.lane.b32.xlu0 %v2540_v56, %s1608_s15 }
 0x2fb   :  { %1260 = vrot.lane.b32.xlu1 %v2558_v57, %s1614_s25  ;;  %1282 = vrot.lane.b32.xlu0 %v2558_v57, %s1613_s24 }
 0x2ff   :  { %1216 = vrot.lane.b32.xlu1 %v2558_v57, %s1603_s10  ;;  %1238 = vrot.lane.b32.xlu0 %v2558_v57, %s1615_s26 }
 0x303   :  { %1172 = vrot.lane.b32.xlu1 %v2558_v57, %s1605_s12  ;;  %1194 = vrot.lane.b32.xlu0 %v2558_v57, %s1604_s11 }
 0x307   :  { %1128 = vrot.lane.b32.xlu1 %v2558_v57, %s1609_s16  ;;  %1150 = vrot.lane.b32.xlu0 %v2558_v57, %s1608_s15 }
 0x31f   :  { %v1038_v52 = vpop.f32.mrf.mxu1 }
 0x320   :  { %v1039_v63 = vadd.f32 %v1038_v52, %v895_v24 }
 0x321   :  { %v1040_v7 = vpop.f32.mrf.mxu1 }
 0x322   :  { %v2576_v25 = vmax.f32 %v1039_v63, 0.0  ;;  %v1041_v20 = vadd.f32 %v1040_v7, %v895_v24 }
 0x324   :  { %1284 = vrot.lane.b32.xlu1 %v2576_v25, %s1613_s24  ;;  %1262 = vrot.lane.b32.xlu0 %v2576_v25, %s1614_s25  ;;  %v2594_v8 = vmax.f32 %v1041_v20, 0.0 }
 0x328   :  { %1240 = vrot.lane.b32.xlu1 %v2576_v25, %s1615_s26  ;;  %1218 = vrot.lane.b32.xlu0 %v2576_v25, %s1603_s10 }
 0x32c   :  { %1196 = vrot.lane.b32.xlu1 %v2576_v25, %s1604_s11  ;;  %1174 = vrot.lane.b32.xlu0 %v2576_v25, %s1605_s12 }
 0x330   :  { %1152 = vrot.lane.b32.xlu1 %v2576_v25, %s1608_s15  ;;  %1130 = vrot.lane.b32.xlu0 %v2576_v25, %s1609_s16  ;;  %v1109_v5 = vpop.f32.mrf.mxu1 }
 0x331   :  { %v1110_v26 = vadd.f32 %v1109_v5, %v895_v24 }
 0x332   :  { %v1111_v3 = vpop.f32.mrf.mxu1 }
 0x333   :  { %v2608_v15 = vmax.f32 %v1110_v26, 0.0  ;;  %v1112_v33 = vadd.f32 %v1111_v3, %v895_v24 }
 0x334   :  { %1242 = vrot.lane.b32.xlu1 %v2594_v8, %s1615_s26  ;;  %1286 = vrot.lane.b32.xlu0 %v2594_v8, %s1613_s24 }
 0x335   :  { %v1119_v32 = vmax.f32 %v1112_v33, 0.0 }
 0x338   :  { %1198 = vrot.lane.b32.xlu1 %v2594_v8, %s1604_s11  ;;  %1264 = vrot.lane.b32.xlu0 %v2594_v8, %s1614_s25 }
 0x33c   :  { %1154 = vrot.lane.b32.xlu1 %v2594_v8, %s1608_s15  ;;  %1220 = vrot.lane.b32.xlu0 %v2594_v8, %s1603_s10 }
 0x340   :  { %1288 = vrot.lane.b32.xlu1 %v2608_v15, %s1613_s24  ;;  %1176 = vrot.lane.b32.xlu0 %v2594_v8, %s1605_s12 }
 0x344   :  { %1266 = vrot.lane.b32.xlu1 %v2608_v15, %s1614_s25  ;;  %1132 = vrot.lane.b32.xlu0 %v2594_v8, %s1609_s16 }
 0x348   :  { %1222 = vrot.lane.b32.xlu1 %v2608_v15, %s1603_s10  ;;  %1244 = vrot.lane.b32.xlu0 %v2608_v15, %s1615_s26 }
 0x34c   :  { %1178 = vrot.lane.b32.xlu1 %v2608_v15, %s1605_s12  ;;  %1200 = vrot.lane.b32.xlu0 %v2608_v15, %s1604_s11 }
 0x350   :  { %1134 = vrot.lane.b32.xlu1 %v2608_v15, %s1609_s16  ;;  %1156 = vrot.lane.b32.xlu0 %v2608_v15, %s1608_s15 }
 0x354   :  { %1268 = vrot.lane.b32.xlu1 %v1119_v32, %s1614_s25  ;;  %1290 = vrot.lane.b32.xlu0 %v1119_v32, %s1613_s24 }
 0x358   :  { %1224 = vrot.lane.b32.xlu1 %v1119_v32, %s1603_s10  ;;  %1246 = vrot.lane.b32.xlu0 %v1119_v32, %s1615_s26 }
 0x35c   :  { %1180 = vrot.lane.b32.xlu1 %v1119_v32, %s1605_s12  ;;  %1202 = vrot.lane.b32.xlu0 %v1119_v32, %s1604_s11 }
 0x35d   :  { %v1259_v59 = vpop.permute.xlu1 %1258  ;;  %v1281_v21 = vpop.permute.xlu0 %1280 }
 0x360   :  { %1136 = vrot.lane.b32.xlu1 %v1119_v32, %s1609_s16  ;;  %1158 = vrot.lane.b32.xlu0 %v1119_v32, %s1608_s15 }
 0x361   :  { %v1215_v49 = vpop.permute.xlu1 %1214  ;;  %v1237_v2 = vpop.permute.xlu0 %1236 }
 0x364   :  { %1306 = vperm.xlu0 %1596, %v1303_v55  }
 0x365   :  { %v1171_v29 = vpop.permute.xlu1 %1170  ;;  %v1193_v1 = vpop.permute.xlu0 %1192 }
 0x369   :  { %v1127_v38 = vpop.permute.xlu1 %1126  ;;  %v1149_v18 = vpop.permute.xlu0 %1148 }
 0x36d   :  { %v1261_v58 = vpop.permute.xlu1 %1260  ;;  %v1283_v46 = vpop.permute.xlu0 %1282 }
 0x36e   :  { %v1292_v39 = vsel %vm314_vm9, %v1281_v21, %v1283_v46  ;;  %v1270_v27 = vsel %vm290_vm12, %v1259_v59, %v1261_v58 }
 0x371   :  { %v1217_v53 = vpop.permute.xlu1 %1216  ;;  %v1239_v42 = vpop.permute.xlu0 %1238 }
 0x372   :  { %v1248_v36 = vsel %vm266_vm14, %v1237_v2, %v1239_v42  ;;  %v1226_v0 = vsel %vm194_vm1, %v1215_v49, %v1217_v53 }
 0x375   :  { %v1173_v10 = vpop.permute.xlu1 %1172  ;;  %v1195_v50 = vpop.permute.xlu0 %1194 }
 0x376   :  { %v1204_v28 = vsel %vm170_vm2, %v1193_v1, %v1195_v50  ;;  %v1182_v6 = vsel %vm2732_vm6, %v1171_v29, %v1173_v10 }
 0x379   :  { %v1129_v11 = vpop.permute.xlu1 %1128  ;;  %v1151_v23 = vpop.permute.xlu0 %1150 }
 0x37a   :  { %v1160_v54 = vsel %vm74_vm10, %v1149_v18, %v1151_v23  ;;  %v1138_v35 = vsel %vm50_vm11, %v1127_v38, %v1129_v11 }
 0x396   :  { %v1285_v16 = vpop.permute.xlu1 %1284  ;;  %v1263_v31 = vpop.permute.xlu0 %1262 }
 0x397   :  { %v1293_v4 = vsel %vm314_vm9, %v1283_v46, %v1285_v16  ;;  %v1271_v44 = vsel %vm290_vm12, %v1261_v58, %v1263_v31 }
 0x398   :  { %1326 = vmatprep.subr.mxu1 %v1293_v4 }
 0x399   :  { %1327 = vmatpush1.msra.mxu1 %v1292_v39 }
 0x39a   :  { %v1241_v19 = vpop.permute.xlu1 %1240  ;;  %1328 = vmatprep.subr.mxu1 %v1271_v44  ;;  %v1219_v62 = vpop.permute.xlu0 %1218 }
 0x39b   :  { %1329 = vmatpush1.msra.mxu1 %v1270_v27  ;;  %v1249_v12 = vsel %vm266_vm14, %v1239_v42, %v1241_v19  ;;  %v1227_v22 = vsel %vm194_vm1, %v1217_v53, %v1219_v62 }
 0x39c   :  { %1330 = vmatprep.subr.mxu1 %v1249_v12 }
 0x39d   :  { %1331 = vmatpush1.msra.mxu1 %v1248_v36 }
 0x39e   :  { %v1197_v48 = vpop.permute.xlu1 %1196  ;;  %1332 = vmatprep.subr.mxu1 %v1227_v22  ;;  %v1175_v13 = vpop.permute.xlu0 %1174 }
 0x39f   :  { %1333 = vmatpush1.msra.mxu1 %v1226_v0  ;;  %v1205_v30 = vsel %vm170_vm2, %v1195_v50, %v1197_v48  ;;  %v1183_v45 = vsel %vm2731_vm5, %v1173_v10, %v1175_v13 }
 0x3a0   :  { %1334 = vmatprep.subr.mxu1 %v1205_v30 }
 0x3a1   :  { %1335 = vmatpush1.msra.mxu1 %v1204_v28 }
 0x3a2   :  { %v1153_v51 = vpop.permute.xlu1 %1152  ;;  %1336 = vmatprep.subr.mxu1 %v1183_v45  ;;  %v1131_v34 = vpop.permute.xlu0 %1130 }
 0x3a3   :  { %1337 = vmatpush1.msra.mxu1 %v1182_v6  ;;  %v1161_v9 = vsel %vm74_vm10, %v1151_v23, %v1153_v51  ;;  %v1139_v37 = vsel %vm50_vm11, %v1129_v11, %v1131_v34 }
 0x3a4   :  { %1338 = vmatprep.subr.mxu1 %v1161_v9 }
 0x3a5   :  { %1339 = vmatpush1.msra.mxu1 %v1160_v54 }
 0x3a6   :  { %v1243_v14 = vpop.permute.xlu1 %1242  ;;  %1340 = vmatprep.subr.mxu1 %v1139_v37  ;;  %v1287_v43 = vpop.permute.xlu0 %1286 }
 0x3a7   :  { %1341 = vmatpush1.msra.mxu1 %v1138_v35  ;;  %v1294_v7 = vsel %vm314_vm9, %v1285_v16, %v1287_v43  ;;  %v1250_v32 = vsel %vm266_vm14, %v1241_v19, %v1243_v14 }
 0x3a8   :  { %1342 = vmatprep.subr.mxu1 %v2558_v57 }
 0x3a9   :  { %1343 = vmatpush1.msra.mxu1 %v2540_v56 }
 0x3aa   :  { %v1199_v24 = vpop.permute.xlu1 %1198  ;;  %1542 = vmatmul.mubr.msk.f32.vlgmr.msra.gmra.mxu1 %vm640_vm13, %v2661_v47  ;;  %v1265_v40 = vpop.permute.xlu0 %1264 }
 0x3ab   :  { %1447 = vmatprep.mubr.f32.mxu1 %v1620_v17  ;;  %v1272_v5 = vsel %vm290_vm12, %v1263_v31, %v1265_v40  ;;  %v1206_v29 = vsel %vm170_vm2, %v1197_v48, %v1199_v24 }
 0x3ae   :  { %v1155_v60 = vpop.permute.xlu1 %1154  ;;  %v1221_v41 = vpop.permute.xlu0 %1220 }
 0x3af   :  { %v1228_v59 = vsel %vm194_vm1, %v1219_v62, %v1221_v41  ;;  %v1162_v53 = vsel %vm74_vm10, %v1153_v51, %v1155_v60 }
 0x3b2   :  { %v1289_v61 = vpop.permute.xlu1 %1288  ;;  %v1177_v52 = vpop.permute.xlu0 %1176 }
 0x3b3   :  { %v1295_v63 = vsel %vm314_vm9, %v1287_v43, %v1289_v61  ;;  %v1184_v38 = vsel %vm2734_vm8, %v1175_v13, %v1177_v52 }
 0x3b4   :  { %1397 = vmatprep.subr.mxu1 %v1295_v63 }
 0x3b5   :  { %1398 = vmatpush1.msra.mxu1 %v1294_v7 }
 0x3b6   :  { %v1267_v57 = vpop.permute.xlu1 %1266  ;;  %v1133_v20 = vpop.permute.xlu0 %1132 }
 0x3b7   :  { %v1273_v56 = vsel %vm290_vm12, %v1265_v40, %v1267_v57  ;;  %v1140_v10 = vsel %vm50_vm11, %v1131_v34, %v1133_v20 }
 0x3b8   :  { %1399 = vmatprep.subr.mxu1 %v1273_v56 }
 0x3b9   :  { %1400 = vmatpush1.msra.mxu1 %v1272_v5 }
 0x3ba   :  { %v1223_v26 = vpop.permute.xlu1 %1222  ;;  %v1245_v3 = vpop.permute.xlu0 %1244 }
 0x3bb   :  { %v1251_v33 = vsel %vm266_vm14, %v1243_v14, %v1245_v3  ;;  %v1229_v55 = vsel %vm194_vm1, %v1221_v41, %v1223_v26 }
 0x3bc   :  { %1401 = vmatprep.subr.mxu1 %v1251_v33 }
 0x3bd   :  { %1402 = vmatpush1.msra.mxu1 %v1250_v32 }
 0x3be   :  { %v1179_v21 = vpop.permute.xlu1 %1178  ;;  %1403 = vmatprep.subr.mxu1 %v1229_v55  ;;  %v1201_v49 = vpop.permute.xlu0 %1200 }
 0x3bf   :  { %1404 = vmatpush1.msra.mxu1 %v1228_v59  ;;  %v1207_v2 = vsel %vm170_vm2, %v1199_v24, %v1201_v49  ;;  %v1185_v1 = vsel %vm2733_vm7, %v1177_v52, %v1179_v21 }
 0x3c0   :  { %1405 = vmatprep.subr.mxu1 %v1207_v2 }
 0x3c1   :  { %1406 = vmatpush1.msra.mxu1 %v1206_v29 }
 0x3c2   :  { %v1135_v18 = vpop.permute.xlu1 %1134  ;;  %1407 = vmatprep.subr.mxu1 %v1185_v1  ;;  %v1157_v58 = vpop.permute.xlu0 %1156 }
 0x3c3   :  { %1408 = vmatpush1.msra.mxu1 %v1184_v38  ;;  %v1163_v46 = vsel %vm74_vm10, %v1155_v60, %v1157_v58  ;;  %v1141_v42 = vsel %vm50_vm11, %v1133_v20, %v1135_v18 }
 0x3c4   :  { %1409 = vmatprep.subr.mxu1 %v1163_v46 }
 0x3c5   :  { %1410 = vmatpush1.msra.mxu1 %v1162_v53 }
 0x3c6   :  { %v1269_v50 = vpop.permute.xlu1 %1268  ;;  %1411 = vmatprep.subr.mxu1 %v1141_v42  ;;  %v1291_v11 = vpop.permute.xlu0 %1290 }
 0x3c7   :  { %v1296_v23 = vsel %vm314_vm9, %v1289_v61, %v1291_v11  ;;  %1412 = vmatpush1.msra.mxu1 %v1140_v10  ;;  %v1274_v16 = vsel %vm290_vm12, %v1267_v57, %v1269_v50  ;;  %vm2735_vm9 = vmmov %vm2731_vm5 }
 0x3c8   :  { %1413 = vmatprep.subr.mxu1 %v2594_v8  ;;  %1556 = vmatpush3.msra.mxu0 %v1296_v23 }
 0x3c9   :  { %1414 = vmatpush1.msra.mxu1 %v2576_v25  ;;  %1557 = vmatprep.subr.mxu0 %v1620_v17 }
 0x3ca   :  { %v1225_v31 = vpop.permute.xlu1 %1224  ;;  %1543 = vmatmul.mubr.msk.f32.vlgmr.msra.gmra.mxu1 %vm640_vm13, %v2661_v47  ;;  %1558 = vmatpush3.msra.mxu0 %v1274_v16  ;;  %v1247_v4 = vpop.permute.xlu0 %1246 }
 0x3cb   :  { %v1252_v39 = vsel %vm266_vm14, %v1245_v3, %v1247_v4  ;;  %1559 = vmatprep.subr.mxu0 %v1620_v17  ;;  %v1230_v8 = vsel %vm194_vm1, %v1223_v26, %v1225_v31 }
 0x3cc   :  { %1560 = vmatpush3.msra.mxu0 %v1252_v39 }
 0x3cd   :  { %1561 = vmatprep.subr.mxu0 %v1620_v17 }
 0x3ce   :  { %v1181_v44 = vpop.permute.xlu1 %1180  ;;  %1562 = vmatpush3.msra.mxu0 %v1230_v8  ;;  %v1203_v25 = vpop.permute.xlu0 %1202 }
 0x3cf   :  { %v1208_v27 = vsel %vm170_vm2, %v1201_v49, %v1203_v25  ;;  %1563 = vmatprep.subr.mxu0 %v1620_v17  ;;  %v1186_v19 = vsel %vm2735_vm9, %v1179_v21, %v1181_v44 }
 0x3d0   :  { %1564 = vmatpush3.msra.mxu0 %v1208_v27 }
 0x3d1   :  { %1565 = vmatprep.subr.mxu0 %v1620_v17 }
 0x3d2   :  { %v1137_v62 = vpop.permute.xlu1 %1136  ;;  %1566 = vmatpush3.msra.mxu0 %v1186_v19  ;;  %v1159_v12 = vpop.permute.xlu0 %1158 }
 0x3d3   :  { %v1164_v36 = vsel %vm74_vm10, %v1157_v58, %v1159_v12  ;;  %1567 = vmatprep.subr.mxu0 %v1620_v17  ;;  %v1142_v22 = vsel %vm50_vm11, %v1135_v18, %v1137_v62 }
 0x3d4   :  { %1568 = vmatpush3.msra.mxu0 %v1164_v36 }
 0x3d5   :  { %1569 = vmatprep.subr.mxu0 %v1620_v17 }
 0x3d6   :  { %1570 = vmatpush3.msra.mxu0 %v1142_v22 }
 0x3d7   :  { %1571 = vmatprep.subr.mxu0 %v1620_v17 }
 0x3d8   :  { %1572 = vmatpush3.msra.mxu0 %v2608_v15 }
 0x3d9   :  { %1574 = vmatmul.mubr.msk.f32.vlgmr.msra.gmra.mxu0 %vm640_vm13, %v2661_v47 }
 0x3df   :  { %v1307_v0 = vpop.permute.xlu0 %1306 }
 0x46a   :  { %v1378_v48 = vpop.f32.mrf.mxu1 }
 0x46b   :  { %v1379_v13 = vadd.f32 %v1378_v48, %v1307_v0 }
 0x46c   :  { %v1380_v30 = vpop.f32.mrf.mxu1 }
 0x46d   :  { %1524 = vst [vmem:[%s2729_s7] sm:$0xff] %v1379_v13  ;;  %v1381_v28 = vadd.f32 %v1380_v30, %v1307_v0 }
 0x46f   :  { %1525 = vst [vmem:[%s2729_s7 + $0x8] sm:$0xff] %v1381_v28 }
 0x48a   :  { %v1449_v45 = vpop.f32.mrf.mxu1 }
 0x48b   :  { %v1450_v17 = vadd.f32 %v1449_v45, %v1307_v0 }
 0x48c   :  { %v1451_v6 = vpop.f32.mrf.mxu1 }
 0x48d   :  { %1526 = vst [vmem:[%s2729_s7 + $0x10] sm:$0xff] %v1450_v17  ;;  %v1452_v15 = vadd.f32 %v1451_v6, %v1307_v0 }
 0x48f   :  { %1527 = vst [vmem:[%s2729_s7 + $0x18] sm:$0xff] %v1452_v15 }
 0x499   :  { %v1520_v51 = vpop.f32.mrf.mxu0 }
 0x49a   :  { %v1521_v34 = vadd.f32 %v1520_v51, %v1307_v0 }
 0x49b   :  { %v1575_v9 = vpop.f32.mrf.mxu0 }
 0x49c   :  { %1528 = vst [vmem:[%s2729_s7 + $0x20] sm:$0xff] %v1521_v34 }

</bundles_post_ra>
